<compile_context>
chip_gen: v5e
topology: v5e:2x2
jax: 0.10.0
libtpu: 0.0.40
codegen_flags: <defaults>
</compile_context>

<pallas_src>
import functools
import math

import jax
import jax.numpy as jnp
from jax.experimental import pallas as pl
from jax.experimental.pallas import tpu as pltpu

LN_EPS = 1e-5          # PyTorch LayerNorm default eps
MASK_BIAS = -1e30      # finite additive bias for padded keys (avoids inf-inf NaN)


def _default_vmem_limit():
    """Generation-dependent scoped-VMEM limit (~75% of capacity, capped at 100 MiB)."""
    cap = None
    try:
        cap = getattr(pltpu.get_tpu_info(), "vmem_capacity_bytes", None)
    except Exception:
        cap = None
    if not cap:
        cap = 64 * 1024 * 1024      # conservative fallback (v7x-sized part)
    return int(max(32 * 1024 * 1024, min(int(cap * 0.75), 100 * 1024 * 1024)))


VMEM_LIMIT = _default_vmem_limit()


def _pick_row_tile(m, max_t=1024):
    for t in (1024, 512, 256, 128, 64, 32, 16, 8):
        if t <= max_t and m % t == 0:
            return t
    return m


def _pick_col_tile(n):
    for t in (2048, 1024, 512, 256, 128):
        if n % t == 0:
            return t
    return n


def _pick_q_tile(seq_len, num_heads):
    """Largest query-row tile whose f32 (H, tq, S) score block stays under ~12 MiB."""
    budget = 12 * 1024 * 1024
    fallback = seq_len
    for t in (512, 256, 128, 64, 32, 16, 8):
        if seq_len % t == 0:
            fallback = t
            if num_heads * t * seq_len * 4 <= budget:
                return t
    return fallback


def _layer_norm(x, gamma, beta):
    """f32 LayerNorm over the last axis (in-kernel helper)."""
    mu = jnp.mean(x, axis=-1, keepdims=True)
    var = jnp.mean(jnp.square(x - mu), axis=-1, keepdims=True)
    return (x - mu) * jax.lax.rsqrt(var + LN_EPS) * gamma + beta


# ---------------------------------------------------------------------------
# Fused encoder-layer kernel (attention sub-layer + FFN sub-layer, post-norm)
# ---------------------------------------------------------------------------
def _fill_kv_scratch(xn, wk_ref, wv_ref, bk_ref, bv_ref, k_scr, v_scr, num_heads):
    """Project K/V for the whole sequence and store head-major (H, S, Dh) bf16."""
    S, D = xn.shape
    Dh = D // num_heads
    xb = xn.astype(jnp.bfloat16)
    k = jnp.dot(xb, wk_ref[...], preferred_element_type=jnp.float32) + bk_ref[...]
    v = jnp.dot(xb, wv_ref[...], preferred_element_type=jnp.float32) + bv_ref[...]
    kb = k.astype(jnp.bfloat16)
    vb = v.astype(jnp.bfloat16)
    for h in range(num_heads):          # static stores into scratch (bounded live ranges)
        sl = slice(h * Dh, (h + 1) * Dh)
        k_scr[h] = kb[:, sl]
        v_scr[h] = vb[:, sl]


def _attn_ffn_tile(bias_ref, wq_ref, bq_ref, wo_ref, bo_ref, g1_ref, b1n_ref,
                   w1_ref, b1f_ref, w2_ref, b2f_ref, g2_ref, b2n_ref,
                   o_ref, xn_scr, k_scr, v_scr, q_scr, ctx_scr, *, num_heads, tq):
    """Attention + FFN for one query-row tile of one batch element."""
    S, D = xn_scr.shape
    H = num_heads
    Dh = D // H
    qi = pl.program_id(1)
    row0 = pl.multiple_of(qi * tq, tq)

    xrows = xn_scr[pl.ds(row0, tq), :]                       # (tq, D) f32 — residual

    # Q projection (1/sqrt(Dh) scale already folded into wq/bq at init).
    q = jnp.dot(xrows.astype(jnp.bfloat16), wq_ref[...],
                preferred_element_type=jnp.float32) + bq_ref[...]
    qb = q.astype(jnp.bfloat16)
    for h in range(H):
        q_scr[h] = qb[:, h * Dh:(h + 1) * Dh]                # (H, tq, Dh) bf16

    # Batched-head QK^T (contract last dims; no explicit k.T transpose).
    s = jax.lax.dot_general(
        q_scr[...], k_scr[...],
        dimension_numbers=(((2,), (2,)), ((0,), (0,))),
        preferred_element_type=jnp.float32)                  # (H, tq, S)
    s = s + bias_ref[...]                                    # (1,1,S) key-padding bias

    m = jnp.max(s, axis=-1, keepdims=True)
    p = jnp.exp(s - m)
    denom = jnp.sum(p, axis=-1, keepdims=True)
    p = p * pl.reciprocal(denom, approx=True)

    # Batched-head PV.
    ctx = jax.lax.dot_general(
        p.astype(jnp.bfloat16), v_scr[...],
        dimension_numbers=(((2,), (1,)), ((0,), (0,))),
        preferred_element_type=jnp.float32)                  # (H, tq, Dh)
    for h in range(H):
        ctx_scr[:, h * Dh:(h + 1) * Dh] = ctx[h].astype(jnp.bfloat16)

    attn = jnp.dot(ctx_scr[...], wo_ref[...],
                   preferred_element_type=jnp.float32) + bo_ref[...]
    y1 = _layer_norm(xrows + attn, g1_ref[...], b1n_ref[...])

    # FFN — the (tq, dim_ff) intermediate stays in VMEM/registers.
    hpre = jnp.dot(y1.astype(jnp.bfloat16), w1_ref[...],
                   preferred_element_type=jnp.float32) + b1f_ref[...]
    hact = jnp.maximum(hpre, 0.0)
    y2 = jnp.dot(hact.astype(jnp.bfloat16), w2_ref[...],
                 preferred_element_type=jnp.float32) + b2f_ref[...]
    o_ref[0] = _layer_norm(y1 + y2, g2_ref[...], b2n_ref[...])


def _encoder_layer_kernel(x_ref, bias_ref,
                          wq_ref, wk_ref, wv_ref, bq_ref, bk_ref, bv_ref,
                          wo_ref, bo_ref, g1_ref, b1n_ref,
                          w1_ref, b1f_ref, w2_ref, b2f_ref, g2_ref, b2n_ref,
                          o_ref, xn_scr, k_scr, v_scr, q_scr, ctx_scr,
                          *, num_heads, tq):
    @pl.when(pl.program_id(1) == 0)
    def _():
        xn = x_ref[0]                                        # (S, D) f32 layer input
        xn_scr[...] = xn
        _fill_kv_scratch(xn, wk_ref, wv_ref, bk_ref, bv_ref, k_scr, v_scr, num_heads)

    _attn_ffn_tile(bias_ref, wq_ref, bq_ref, wo_ref, bo_ref, g1_ref, b1n_ref,
                   w1_ref, b1f_ref, w2_ref, b2f_ref, g2_ref, b2n_ref,
                   o_ref, xn_scr, k_scr, v_scr, q_scr, ctx_scr,
                   num_heads=num_heads, tq=tq)


def _encoder_layer_emb_kernel(x_ref, bias_ref, pos_ref, eg_ref, eb_ref,
                              wq_ref, wk_ref, wv_ref, bq_ref, bk_ref, bv_ref,
                              wo_ref, bo_ref, g1_ref, b1n_ref,
                              w1_ref, b1f_ref, w2_ref, b2f_ref, g2_ref, b2n_ref,
                              o_ref, xn_scr, k_scr, v_scr, q_scr, ctx_scr,
                              *, num_heads, tq):
    """First layer: also fuses (token_emb + pos_emb) add and the embedding LayerNorm."""
    @pl.when(pl.program_id(1) == 0)
    def _():
        xn = _layer_norm(x_ref[0] + pos_ref[...], eg_ref[...], eb_ref[...])
        xn_scr[...] = xn
        _fill_kv_scratch(xn, wk_ref, wv_ref, bk_ref, bv_ref, k_scr, v_scr, num_heads)

    _attn_ffn_tile(bias_ref, wq_ref, bq_ref, wo_ref, bo_ref, g1_ref, b1n_ref,
                   w1_ref, b1f_ref, w2_ref, b2f_ref, g2_ref, b2n_ref,
                   o_ref, xn_scr, k_scr, v_scr, q_scr, ctx_scr,
                   num_heads=num_heads, tq=tq)


def encoder_layer(x, pad_bias, lp, num_heads, *, emb=None):
    """x: [B, S, D] f32; pad_bias: [B, 1, S] additive bias; emb: (pos, gamma, beta) or None."""
    B, S, D = x.shape
    assert D % num_heads == 0
    H = num_heads
    Dh = D // H
    FF = lp["w1_t"].shape[1]
    tq = _pick_q_tile(S, H)
    nq = S // tq if S % tq == 0 else 1

    def const(shape):
        return pl.BlockSpec(shape, lambda b, qi: (0,) * len(shape))

    in_specs = [
        pl.BlockSpec((1, S, D), lambda b, qi: (b, 0, 0)),    # x (full seq, resident per b)
        pl.BlockSpec((1, 1, S), lambda b, qi: (b, 0, 0)),    # key-padding bias
    ]
    args = [x, pad_bias]

    if emb is not None:
        pos, eg, eb = emb
        in_specs += [const((S, D)), const((1, D)), const((1, D))]
        args += [pos, eg, eb]
        kern = functools.partial(_encoder_layer_emb_kernel, num_heads=H, tq=tq)
    else:
        kern = functools.partial(_encoder_layer_kernel, num_heads=H, tq=tq)

    # Constant-index weight blocks (stay resident across the whole grid).
    in_specs += [
        const((D, D)), const((D, D)), const((D, D)),          # wq_t, wk_t, wv_t
        const((1, D)), const((1, D)), const((1, D)),          # bq, bk, bv
        const((D, D)), const((1, D)),                          # wo_t, bo
        const((1, D)), const((1, D)),                          # norm1 gamma, beta
        const((D, FF)), const((1, FF)),                         # w1_t, b1
        const((FF, D)), const((1, D)),                          # w2_t, b2
        const((1, D)), const((1, D)),                           # norm2 gamma, beta
    ]
    args += [lp["wq_t"], lp["wk_t"], lp["wv_t"], lp["bq"], lp["bk"], lp["bv"],
             lp["wo_t"], lp["bo"], lp["norm1_g"], lp["norm1_b"],
             lp["w1_t"], lp["b1"], lp["w2_t"], lp["b2"],
             lp["norm2_g"], lp["norm2_b"]]

    return pl.pallas_call(
        kern,
        out_shape=jax.ShapeDtypeStruct((B, S, D), jnp.float32),
        grid=(B, nq),
        in_specs=in_specs,
        out_specs=pl.BlockSpec((1, S // nq, D), lambda b, qi: (b, qi, 0)),
        scratch_shapes=[
            pltpu.VMEM((S, D), jnp.float32),                  # normalized layer input
            pltpu.VMEM((H, S, Dh), jnp.bfloat16),             # K (head-major)
            pltpu.VMEM((H, S, Dh), jnp.bfloat16),             # V (head-major)
            pltpu.VMEM((H, S // nq, Dh), jnp.bfloat16),       # Q tile (head-major)
            pltpu.VMEM((S // nq, D), jnp.bfloat16),           # attention context tile
        ],
        compiler_params=pltpu.CompilerParams(
            dimension_semantics=("parallel", "arbitrary"),
            vmem_limit_bytes=VMEM_LIMIT),
    )(*args)


# ---------------------------------------------------------------------------
# Final LayerNorm fused into the to_token projection
# ---------------------------------------------------------------------------
def _ln_matmul_kernel(x_ref, g_ref, b_ref, w_ref, o_ref):
    xn = _layer_norm(x_ref[...], g_ref[...], b_ref[...])
    o_ref[...] = jnp.dot(xn.astype(jnp.bfloat16), w_ref[...],
                         preferred_element_type=jnp.float32)


def final_norm_logits(x2d, gamma, beta, w_t):
    M, D = x2d.shape
    N = w_t.shape[1]
    tn = _pick_col_tile(N)
    # Keep the double-buffered f32 output tile under ~16 MiB.
    tm = _pick_row_tile(M, max_t=max(8, (8 * 1024 * 1024) // (tn * 4)))
    return pl.pallas_call(
        _ln_matmul_kernel,
        out_shape=jax.ShapeDtypeStruct((M, N), jnp.float32),
        grid=(M // tm, N // tn),      # vocab (j) is innermost -> x/g/b stay resident
        in_specs=[
            pl.BlockSpec((tm, D), lambda i, j: (i, 0)),
            pl.BlockSpec((1, D), lambda i, j: (0, 0)),
            pl.BlockSpec((1, D), lambda i, j: (0, 0)),
            pl.BlockSpec((D, tn), lambda i, j: (0, j)),
        ],
        out_specs=pl.BlockSpec((tm, tn), lambda i, j: (i, j)),
        compiler_params=pltpu.CompilerParams(
            dimension_semantics=("parallel", "parallel"),
            vmem_limit_bytes=VMEM_LIMIT),
    )(x2d, gamma, beta, w_t)


# ---------------------------------------------------------------------------
# Parameters / model glue
# ---------------------------------------------------------------------------
def sinusoidal_pe(max_len, d_model):
    position = jnp.arange(max_len, dtype=jnp.float32)[:, None]
    div_term = jnp.exp(
        jnp.arange(0, d_model, 2, dtype=jnp.float32) * (-math.log(10000.0) / d_model))
    pe = jnp.zeros((max_len, d_model), jnp.float32)
    pe = pe.at[:, 0::2].set(jnp.sin(position * div_term))
    pe = pe.at[:, 1::2].set(jnp.cos(position * div_term))
    return pe


def init_params(key, *, d_model, nhead, dim_ff, num_layers, vocab_size,
                max_seq_length, padding_idx):
    assert d_model % nhead == 0
    scale = 1.0 / math.sqrt(d_model // nhead)
    keys = jax.random.split(key, 4 + num_layers)
    tok_emb = 0.02 * jax.random.normal(keys[0], (vocab_size, d_model), jnp.float32)
    tok_emb = tok_emb.at[padding_idx].set(0.0)   # nn.Embedding padding_idx row is zero

    def w_t(k, out_dim, in_dim, s=1.0):
        # torch Linear weight is [out, in]; store pre-transposed [in, out] in bf16.
        w = 0.05 * jax.random.normal(k, (out_dim, in_dim), jnp.float32)
        return jnp.asarray(w.T * s, jnp.bfloat16)

    params = {
        "tok_emb": tok_emb,
        "pos_emb": sinusoidal_pe(max_seq_length, d_model),
        "emb_norm_g": jnp.ones((1, d_model), jnp.float32),
        "emb_norm_b": jnp.zeros((1, d_model), jnp.float32),
        "final_norm_g": jnp.ones((1, d_model), jnp.float32),
        "final_norm_b": jnp.zeros((1, d_model), jnp.float32),
        "to_token_w_t": w_t(keys[1], vocab_size, d_model),     # [D, vocab] bf16
        "layers": [],
    }
    for li in range(num_layers):
        lk = jax.random.split(keys[4 + li], 8)
        layer = {
            # 1/sqrt(Dh) attention scale folded into the Q projection (weight AND bias).
            "wq_t": w_t(lk[0], d_model, d_model, s=scale),
            "wk_t": w_t(lk[1], d_model, d_model),
            "wv_t": w_t(lk[2], d_model, d_model),
            "bq": jnp.zeros((1, d_model), jnp.float32) * scale,
            "bk": jnp.zeros((1, d_model), jnp.float32),
            "bv": jnp.zeros((1, d_model), jnp.float32),
            "wo_t": w_t(lk[3], d_model, d_model),
            "bo": jnp.zeros((1, d_model), jnp.float32),
            "w1_t": w_t(lk[4], dim_ff, d_model),               # [D, FF] bf16
            "b1": 0.01 * jax.random.normal(lk[5], (1, dim_ff), jnp.float32),
            "w2_t": w_t(lk[6], d_model, dim_ff),               # [FF, D] bf16
            "b2": 0.01 * jax.random.normal(lk[7], (1, d_model), jnp.float32),
            "norm1_g": jnp.ones((1, d_model), jnp.float32),
            "norm1_b": jnp.zeros((1, d_model), jnp.float32),
            "norm2_g": jnp.ones((1, d_model), jnp.float32),
            "norm2_b": jnp.zeros((1, d_model), jnp.float32),
        }
        params["layers"].append(layer)
    return params


def ditbert_forward(src, params, *, num_heads, padding_idx):
    """DitBERTModel.forward: embedding -> N post-norm encoder layers -> norm -> to_token."""
    B, S = src.shape
    D = params["tok_emb"].shape[1]

    # TODO(synk): token-id embedding gather is data-dependent, done with jnp.take
    # outside the kernels; everything downstream (emb LN, layers, final proj) is Pallas.
    tok = jnp.take(params["tok_emb"], src, axis=0)            # [B, S, D] f32
    pos = params["pos_emb"][:S]                               # [S, D]

    # src_key_padding_mask as an additive bias (finite, avoids NaN for all-pad rows)
    pad_bias = (src == padding_idx).astype(jnp.float32)[:, None, :] * jnp.float32(MASK_BIAS)

    layers = params["layers"]
    if not layers:
        x = _layer_norm((tok + pos[None]).astype(jnp.float32),
                        params["emb_norm_g"], params["emb_norm_b"])
    else:
        x = tok
        emb = (pos, params["emb_norm_g"], params["emb_norm_b"])
        for li, lp in enumerate(layers):
            # Fused per-layer kernel; the first one also applies the embedding LN.
            x = encoder_layer(x, pad_bias, lp, num_heads,
                              emb=emb if li == 0 else None)

    logits = final_norm_logits(x.reshape(B * S, D),
                               params["final_norm_g"], params["final_norm_b"],
                               params["to_token_w_t"])
    return logits.reshape(B, S, -1)                            # [B, S, vocab]


# ---------------------------------------------------------------------------
if __name__ == "__main__":
    D_MODEL = 32
    NHEAD = 4
    DIM_FF = 64
    NUM_LAYERS = 2
    VOCAB = 64
    MAX_SEQ = 16
    PAD_IDX = 0
    B, S = 2, 8

    key = jax.random.PRNGKey(0)
    pkey, skey = jax.random.split(key)
    params = init_params(
        pkey,
        d_model=D_MODEL,
        nhead=NHEAD,
        dim_ff=DIM_FF,
        num_layers=NUM_LAYERS,
        vocab_size=VOCAB,
        max_seq_length=MAX_SEQ,
        padding_idx=PAD_IDX,
    )

    # Token ids in [1, VOCAB); pad the tail of each sequence with PAD_IDX.
    src = jax.random.randint(skey, (B, S), minval=1, maxval=VOCAB, dtype=jnp.int32)
    src = src.at[:, -2:].set(PAD_IDX)

    out = ditbert_forward(src, params, num_heads=NHEAD, padding_idx=PAD_IDX)
    out = jax.block_until_ready(out)
    assert out.shape == (B, S, VOCAB), out.shape
    assert bool(jnp.all(jnp.isfinite(out)))
    print("KERNEL_OK")
</pallas_src>

<mosaic_0001>
module attributes {stable_mosaic.version = 11 : i64} {
  func.func @_encoder_layer_emb_kernel(%arg0: i32, %arg1: i32, %arg2: memref<1x8x32xf32, #tpu.memory_space<vmem>>, %arg3: memref<1x1x8xf32, #tpu.memory_space<vmem>>, %arg4: memref<8x32xf32, #tpu.memory_space<vmem>>, %arg5: memref<1x32xf32, #tpu.memory_space<vmem>>, %arg6: memref<1x32xf32, #tpu.memory_space<vmem>>, %arg7: memref<32x32xbf16, #tpu.memory_space<vmem>>, %arg8: memref<32x32xbf16, #tpu.memory_space<vmem>>, %arg9: memref<32x32xbf16, #tpu.memory_space<vmem>>, %arg10: memref<1x32xf32, #tpu.memory_space<vmem>>, %arg11: memref<1x32xf32, #tpu.memory_space<vmem>>, %arg12: memref<1x32xf32, #tpu.memory_space<vmem>>, %arg13: memref<32x32xbf16, #tpu.memory_space<vmem>>, %arg14: memref<1x32xf32, #tpu.memory_space<vmem>>, %arg15: memref<1x32xf32, #tpu.memory_space<vmem>>, %arg16: memref<1x32xf32, #tpu.memory_space<vmem>>, %arg17: memref<32x64xbf16, #tpu.memory_space<vmem>>, %arg18: memref<1x64xf32, #tpu.memory_space<vmem>>, %arg19: memref<64x32xbf16, #tpu.memory_space<vmem>>, %arg20: memref<1x32xf32, #tpu.memory_space<vmem>>, %arg21: memref<1x32xf32, #tpu.memory_space<vmem>>, %arg22: memref<1x32xf32, #tpu.memory_space<vmem>>, %arg23: memref<1x8x32xf32, #tpu.memory_space<vmem>>, %arg24: memref<8x32xf32, #tpu.memory_space<vmem>>, %arg25: memref<4x8x8xbf16, #tpu.memory_space<vmem>>, %arg26: memref<4x8x8xbf16, #tpu.memory_space<vmem>>, %arg27: memref<4x8x8xbf16, #tpu.memory_space<vmem>>, %arg28: memref<8x32xbf16, #tpu.memory_space<vmem>>) attributes {dimension_semantics = [#tpu.dimension_semantics<parallel>, #tpu.dimension_semantics<arbitrary>], iteration_bounds = array<i64: 2, 1>, scalar_prefetch = 0 : i64, scratch_operands = 5 : i64, tpu.core_type = #tpu.core_type<tc>, window_params = [{transform_indices = @transform_0, window_bounds = array<i64: 1, 8, 32>}, {transform_indices = @transform_1, window_bounds = array<i64: 1, 1, 8>}, {pipeline_mode = #tpu.pipeline_mode<synchronous>, transform_indices = @transform_2, window_bounds = array<i64: 8, 32>}, {pipeline_mode = #tpu.pipeline_mode<synchronous>, transform_indices = @transform_3, window_bounds = array<i64: 1, 32>}, {pipeline_mode = #tpu.pipeline_mode<synchronous>, transform_indices = @transform_4, window_bounds = array<i64: 1, 32>}, {pipeline_mode = #tpu.pipeline_mode<synchronous>, transform_indices = @transform_5, window_bounds = array<i64: 32, 32>}, {pipeline_mode = #tpu.pipeline_mode<synchronous>, transform_indices = @transform_6, window_bounds = array<i64: 32, 32>}, {pipeline_mode = #tpu.pipeline_mode<synchronous>, transform_indices = @transform_7, window_bounds = array<i64: 32, 32>}, {pipeline_mode = #tpu.pipeline_mode<synchronous>, transform_indices = @transform_8, window_bounds = array<i64: 1, 32>}, {pipeline_mode = #tpu.pipeline_mode<synchronous>, transform_indices = @transform_9, window_bounds = array<i64: 1, 32>}, {pipeline_mode = #tpu.pipeline_mode<synchronous>, transform_indices = @transform_10, window_bounds = array<i64: 1, 32>}, {pipeline_mode = #tpu.pipeline_mode<synchronous>, transform_indices = @transform_11, window_bounds = array<i64: 32, 32>}, {pipeline_mode = #tpu.pipeline_mode<synchronous>, transform_indices = @transform_12, window_bounds = array<i64: 1, 32>}, {pipeline_mode = #tpu.pipeline_mode<synchronous>, transform_indices = @transform_13, window_bounds = array<i64: 1, 32>}, {pipeline_mode = #tpu.pipeline_mode<synchronous>, transform_indices = @transform_14, window_bounds = array<i64: 1, 32>}, {pipeline_mode = #tpu.pipeline_mode<synchronous>, transform_indices = @transform_15, window_bounds = array<i64: 32, 64>}, {pipeline_mode = #tpu.pipeline_mode<synchronous>, transform_indices = @transform_16, window_bounds = array<i64: 1, 64>}, {pipeline_mode = #tpu.pipeline_mode<synchronous>, transform_indices = @transform_17, window_bounds = array<i64: 64, 32>}, {pipeline_mode = #tpu.pipeline_mode<synchronous>, transform_indices = @transform_18, window_bounds = array<i64: 1, 32>}, {pipeline_mode = #tpu.pipeline_mode<synchronous>, transform_indices = @transform_19, window_bounds = array<i64: 1, 32>}, {pipeline_mode = #tpu.pipeline_mode<synchronous>, transform_indices = @transform_20, window_bounds = array<i64: 1, 32>}, {transform_indices = @transform_21, window_bounds = array<i64: 1, 8, 32>}]} {
    %c0_i32 = arith.constant 0 : i32
    %0 = arith.cmpi eq, %arg1, %c0_i32 : i32
    %1 = arith.extui %0 : i1 to i32
    %c0_i32_0 = arith.constant 0 : i32
    %2 = arith.cmpi ne, %1, %c0_i32_0 : i32
    scf.if %2 {
      %c0_74 = arith.constant 0 : index
      %c0_75 = arith.constant 0 : index
      %c0_76 = arith.constant 0 : index
      %138 = vector.load %arg2[%c0_74, %c0_75, %c0_76] : memref<1x8x32xf32, #tpu.memory_space<vmem>>, vector<1x8x32xf32>
      %139 = vector.shape_cast %138 : vector<1x8x32xf32> to vector<8x32xf32>
      %c0_77 = arith.constant 0 : index
      %c0_78 = arith.constant 0 : index
      %140 = vector.load %arg4[%c0_77, %c0_78] : memref<8x32xf32, #tpu.memory_space<vmem>>, vector<8x32xf32>
      %141 = arith.addf %139, %140 : vector<8x32xf32>
      %c0_79 = arith.constant 0 : index
      %c0_80 = arith.constant 0 : index
      %142 = vector.load %arg5[%c0_79, %c0_80] : memref<1x32xf32, #tpu.memory_space<vmem>>, vector<1x32xf32>
      %c0_81 = arith.constant 0 : index
      %c0_82 = arith.constant 0 : index
      %143 = vector.load %arg6[%c0_81, %c0_82] : memref<1x32xf32, #tpu.memory_space<vmem>>, vector<1x32xf32>
      %cst_83 = arith.constant dense<0.000000e+00> : vector<8xf32>
      %144 = vector.multi_reduction <add>, %141, %cst_83 [1] : vector<8x32xf32> to vector<8xf32>
      %145 = vector.shape_cast %144 : vector<8xf32> to vector<8x1xf32>
      %cst_84 = arith.constant 3.200000e+01 : f32
      %146 = vector.broadcast %cst_84 : f32 to vector<8x1xf32>
      %147 = arith.divf %145, %146 : vector<8x1xf32>
      %148 = vector.broadcast %147 : vector<8x1xf32> to vector<8x32xf32>
      %149 = arith.subf %141, %148 : vector<8x32xf32>
      %150 = arith.mulf %149, %149 : vector<8x32xf32>
      %cst_85 = arith.constant dense<0.000000e+00> : vector<8xf32>
      %151 = vector.multi_reduction <add>, %150, %cst_85 [1] : vector<8x32xf32> to vector<8xf32>
      %152 = vector.shape_cast %151 : vector<8xf32> to vector<8x1xf32>
      %cst_86 = arith.constant 3.200000e+01 : f32
      %153 = vector.broadcast %cst_86 : f32 to vector<8x1xf32>
      %154 = arith.divf %152, %153 : vector<8x1xf32>
      %155 = vector.broadcast %147 : vector<8x1xf32> to vector<8x32xf32>
      %156 = arith.subf %141, %155 : vector<8x32xf32>
      %cst_87 = arith.constant 9.99999974E-6 : f32
      %157 = vector.broadcast %cst_87 : f32 to vector<8x1xf32>
      %158 = arith.addf %154, %157 : vector<8x1xf32>
      %159 = math.rsqrt %158 : vector<8x1xf32>
      %160 = vector.broadcast %159 : vector<8x1xf32> to vector<8x32xf32>
      %161 = arith.mulf %156, %160 : vector<8x32xf32>
      %162 = vector.broadcast %142 : vector<1x32xf32> to vector<8x32xf32>
      %163 = arith.mulf %161, %162 : vector<8x32xf32>
      %164 = vector.broadcast %143 : vector<1x32xf32> to vector<8x32xf32>
      %165 = arith.addf %163, %164 : vector<8x32xf32>
      %c0_88 = arith.constant 0 : index
      %c0_89 = arith.constant 0 : index
      %166 = vector.load %arg24[%c0_88, %c0_89] : memref<8x32xf32, #tpu.memory_space<vmem>>, vector<8x32xf32>
      tpu.vector_store %arg24[%c0_88, %c0_89], %165 {strides = array<i32>} : memref<8x32xf32, #tpu.memory_space<vmem>>, vector<8x32xf32>,
      %167 = arith.truncf %165 : vector<8x32xf32> to vector<8x32xbf16>
      %c0_90 = arith.constant 0 : index
      %c0_91 = arith.constant 0 : index
      %168 = vector.load %arg8[%c0_90, %c0_91] : memref<32x32xbf16, #tpu.memory_space<vmem>>, vector<32x32xbf16>
      %cst_92 = arith.constant dense<0.000000e+00> : vector<8x32xf32>
      %169 = tpu.matmul %167, %168, %cst_92 {dimension_numbers = #tpu.dot_dimension_numbers<[1], [0], [0], [1], [0, 0, 1, 1], [], []>} : vector<8x32xbf16>, vector<32x32xbf16>, vector<8x32xf32> -> vector<8x32xf32>
      %c0_93 = arith.constant 0 : index
      %c0_94 = arith.constant 0 : index
      %170 = vector.load %arg11[%c0_93, %c0_94] : memref<1x32xf32, #tpu.memory_space<vmem>>, vector<1x32xf32>
      %171 = vector.broadcast %170 : vector<1x32xf32> to vector<8x32xf32>
      %172 = arith.addf %169, %171 : vector<8x32xf32>
      %c0_95 = arith.constant 0 : index
      %c0_96 = arith.constant 0 : index
      %173 = vector.load %arg9[%c0_95, %c0_96] : memref<32x32xbf16, #tpu.memory_space<vmem>>, vector<32x32xbf16>
      %cst_97 = arith.constant dense<0.000000e+00> : vector<8x32xf32>
      %174 = tpu.matmul %167, %173, %cst_97 {dimension_numbers = #tpu.dot_dimension_numbers<[1], [0], [0], [1], [0, 0, 1, 1], [], []>} : vector<8x32xbf16>, vector<32x32xbf16>, vector<8x32xf32> -> vector<8x32xf32>
      %c0_98 = arith.constant 0 : index
      %c0_99 = arith.constant 0 : index
      %175 = vector.load %arg12[%c0_98, %c0_99] : memref<1x32xf32, #tpu.memory_space<vmem>>, vector<1x32xf32>
      %176 = vector.broadcast %175 : vector<1x32xf32> to vector<8x32xf32>
      %177 = arith.addf %174, %176 : vector<8x32xf32>
      %178 = arith.truncf %172 : vector<8x32xf32> to vector<8x32xbf16>
      %179 = arith.truncf %177 : vector<8x32xf32> to vector<8x32xbf16>
      %180 = vector.extract_strided_slice %178 {offsets = [0, 0], sizes = [8, 8], strides = [1, 1]} : vector<8x32xbf16> to vector<8x8xbf16>
      %c0_100 = arith.constant 0 : index
      %c0_101 = arith.constant 0 : index
      %c0_102 = arith.constant 0 : index
      %181 = vector.load %arg25[%c0_100, %c0_101, %c0_102] : memref<4x8x8xbf16, #tpu.memory_space<vmem>>, vector<1x8x8xbf16>
      %182 = vector.shape_cast %181 : vector<1x8x8xbf16> to vector<8x8xbf16>
      %183 = vector.shape_cast %180 : vector<8x8xbf16> to vector<1x8x8xbf16>
      tpu.vector_store %arg25[%c0_100, %c0_101, %c0_102], %183 {strides = array<i32>} : memref<4x8x8xbf16, #tpu.memory_space<vmem>>, vector<1x8x8xbf16>,
      %184 = vector.extract_strided_slice %179 {offsets = [0, 0], sizes = [8, 8], strides = [1, 1]} : vector<8x32xbf16> to vector<8x8xbf16>
      %c0_103 = arith.constant 0 : index
      %c0_104 = arith.constant 0 : index
      %c0_105 = arith.constant 0 : index
      %185 = vector.load %arg26[%c0_103, %c0_104, %c0_105] : memref<4x8x8xbf16, #tpu.memory_space<vmem>>, vector<1x8x8xbf16>
      %186 = vector.shape_cast %185 : vector<1x8x8xbf16> to vector<8x8xbf16>
      %187 = vector.shape_cast %184 : vector<8x8xbf16> to vector<1x8x8xbf16>
      tpu.vector_store %arg26[%c0_103, %c0_104, %c0_105], %187 {strides = array<i32>} : memref<4x8x8xbf16, #tpu.memory_space<vmem>>, vector<1x8x8xbf16>,
      %188 = vector.extract_strided_slice %178 {offsets = [0, 8], sizes = [8, 8], strides = [1, 1]} : vector<8x32xbf16> to vector<8x8xbf16>
      %c1_106 = arith.constant 1 : index
      %c0_107 = arith.constant 0 : index
      %c0_108 = arith.constant 0 : index
      %189 = vector.load %arg25[%c1_106, %c0_107, %c0_108] : memref<4x8x8xbf16, #tpu.memory_space<vmem>>, vector<1x8x8xbf16>
      %190 = vector.shape_cast %189 : vector<1x8x8xbf16> to vector<8x8xbf16>
      %191 = vector.shape_cast %188 : vector<8x8xbf16> to vector<1x8x8xbf16>
      tpu.vector_store %arg25[%c1_106, %c0_107, %c0_108], %191 {strides = array<i32>} : memref<4x8x8xbf16, #tpu.memory_space<vmem>>, vector<1x8x8xbf16>,
      %192 = vector.extract_strided_slice %179 {offsets = [0, 8], sizes = [8, 8], strides = [1, 1]} : vector<8x32xbf16> to vector<8x8xbf16>
      %c1_109 = arith.constant 1 : index
      %c0_110 = arith.constant 0 : index
      %c0_111 = arith.constant 0 : index
      %193 = vector.load %arg26[%c1_109, %c0_110, %c0_111] : memref<4x8x8xbf16, #tpu.memory_space<vmem>>, vector<1x8x8xbf16>
      %194 = vector.shape_cast %193 : vector<1x8x8xbf16> to vector<8x8xbf16>
      %195 = vector.shape_cast %192 : vector<8x8xbf16> to vector<1x8x8xbf16>
      tpu.vector_store %arg26[%c1_109, %c0_110, %c0_111], %195 {strides = array<i32>} : memref<4x8x8xbf16, #tpu.memory_space<vmem>>, vector<1x8x8xbf16>,
      %196 = vector.extract_strided_slice %178 {offsets = [0, 16], sizes = [8, 8], strides = [1, 1]} : vector<8x32xbf16> to vector<8x8xbf16>
      %c2_112 = arith.constant 2 : index
      %c0_113 = arith.constant 0 : index
      %c0_114 = arith.constant 0 : index
      %197 = vector.load %arg25[%c2_112, %c0_113, %c0_114] : memref<4x8x8xbf16, #tpu.memory_space<vmem>>, vector<1x8x8xbf16>
      %198 = vector.shape_cast %197 : vector<1x8x8xbf16> to vector<8x8xbf16>
      %199 = vector.shape_cast %196 : vector<8x8xbf16> to vector<1x8x8xbf16>
      tpu.vector_store %arg25[%c2_112, %c0_113, %c0_114], %199 {strides = array<i32>} : memref<4x8x8xbf16, #tpu.memory_space<vmem>>, vector<1x8x8xbf16>,
      %200 = vector.extract_strided_slice %179 {offsets = [0, 16], sizes = [8, 8], strides = [1, 1]} : vector<8x32xbf16> to vector<8x8xbf16>
      %c2_115 = arith.constant 2 : index
      %c0_116 = arith.constant 0 : index
      %c0_117 = arith.constant 0 : index
      %201 = vector.load %arg26[%c2_115, %c0_116, %c0_117] : memref<4x8x8xbf16, #tpu.memory_space<vmem>>, vector<1x8x8xbf16>
      %202 = vector.shape_cast %201 : vector<1x8x8xbf16> to vector<8x8xbf16>
      %203 = vector.shape_cast %200 : vector<8x8xbf16> to vector<1x8x8xbf16>
      tpu.vector_store %arg26[%c2_115, %c0_116, %c0_117], %203 {strides = array<i32>} : memref<4x8x8xbf16, #tpu.memory_space<vmem>>, vector<1x8x8xbf16>,
      %204 = vector.extract_strided_slice %178 {offsets = [0, 24], sizes = [8, 8], strides = [1, 1]} : vector<8x32xbf16> to vector<8x8xbf16>
      %c3_118 = arith.constant 3 : index
      %c0_119 = arith.constant 0 : index
      %c0_120 = arith.constant 0 : index
      %205 = vector.load %arg25[%c3_118, %c0_119, %c0_120] : memref<4x8x8xbf16, #tpu.memory_space<vmem>>, vector<1x8x8xbf16>
      %206 = vector.shape_cast %205 : vector<1x8x8xbf16> to vector<8x8xbf16>
      %207 = vector.shape_cast %204 : vector<8x8xbf16> to vector<1x8x8xbf16>
      tpu.vector_store %arg25[%c3_118, %c0_119, %c0_120], %207 {strides = array<i32>} : memref<4x8x8xbf16, #tpu.memory_space<vmem>>, vector<1x8x8xbf16>,
      %208 = vector.extract_strided_slice %179 {offsets = [0, 24], sizes = [8, 8], strides = [1, 1]} : vector<8x32xbf16> to vector<8x8xbf16>
      %c3_121 = arith.constant 3 : index
      %c0_122 = arith.constant 0 : index
      %c0_123 = arith.constant 0 : index
      %209 = vector.load %arg26[%c3_121, %c0_122, %c0_123] : memref<4x8x8xbf16, #tpu.memory_space<vmem>>, vector<1x8x8xbf16>
      %210 = vector.shape_cast %209 : vector<1x8x8xbf16> to vector<8x8xbf16>
      %211 = vector.shape_cast %208 : vector<8x8xbf16> to vector<1x8x8xbf16>
      tpu.vector_store %arg26[%c3_121, %c0_122, %c0_123], %211 {strides = array<i32>} : memref<4x8x8xbf16, #tpu.memory_space<vmem>>, vector<1x8x8xbf16>,
    } else {
    }
    %c8_i32 = arith.constant 8 : i32
    %3 = arith.muli %arg1, %c8_i32 : i32
    %4 = tpu.assume_multiple %3, 8 : i32
    %5 = arith.index_cast %4 : i32 to index
    %c0 = arith.constant 0 : index
    %6 = vector.load %arg24[%5, %c0] : memref<8x32xf32, #tpu.memory_space<vmem>>, vector<8x32xf32>
    %7 = arith.truncf %6 : vector<8x32xf32> to vector<8x32xbf16>
    %c0_1 = arith.constant 0 : index
    %c0_2 = arith.constant 0 : index
    %8 = vector.load %arg7[%c0_1, %c0_2] : memref<32x32xbf16, #tpu.memory_space<vmem>>, vector<32x32xbf16>
    %cst = arith.constant dense<0.000000e+00> : vector<8x32xf32>
    %9 = tpu.matmul %7, %8, %cst {dimension_numbers = #tpu.dot_dimension_numbers<[1], [0], [0], [1], [0, 0, 1, 1], [], []>} : vector<8x32xbf16>, vector<32x32xbf16>, vector<8x32xf32> -> vector<8x32xf32>
    %c0_3 = arith.constant 0 : index
    %c0_4 = arith.constant 0 : index
    %10 = vector.load %arg10[%c0_3, %c0_4] : memref<1x32xf32, #tpu.memory_space<vmem>>, vector<1x32xf32>
    %11 = vector.broadcast %10 : vector<1x32xf32> to vector<8x32xf32>
    %12 = arith.addf %9, %11 : vector<8x32xf32>
    %13 = arith.truncf %12 : vector<8x32xf32> to vector<8x32xbf16>
    %14 = vector.extract_strided_slice %13 {offsets = [0, 0], sizes = [8, 8], strides = [1, 1]} : vector<8x32xbf16> to vector<8x8xbf16>
    %c0_5 = arith.constant 0 : index
    %c0_6 = arith.constant 0 : index
    %c0_7 = arith.constant 0 : index
    %15 = vector.load %arg27[%c0_5, %c0_6, %c0_7] : memref<4x8x8xbf16, #tpu.memory_space<vmem>>, vector<1x8x8xbf16>
    %16 = vector.shape_cast %15 : vector<1x8x8xbf16> to vector<8x8xbf16>
    %17 = vector.shape_cast %14 : vector<8x8xbf16> to vector<1x8x8xbf16>
    tpu.vector_store %arg27[%c0_5, %c0_6, %c0_7], %17 {strides = array<i32>} : memref<4x8x8xbf16, #tpu.memory_space<vmem>>, vector<1x8x8xbf16>,
    %18 = vector.extract_strided_slice %13 {offsets = [0, 8], sizes = [8, 8], strides = [1, 1]} : vector<8x32xbf16> to vector<8x8xbf16>
    %c1 = arith.constant 1 : index
    %c0_8 = arith.constant 0 : index
    %c0_9 = arith.constant 0 : index
    %19 = vector.load %arg27[%c1, %c0_8, %c0_9] : memref<4x8x8xbf16, #tpu.memory_space<vmem>>, vector<1x8x8xbf16>
    %20 = vector.shape_cast %19 : vector<1x8x8xbf16> to vector<8x8xbf16>
    %21 = vector.shape_cast %18 : vector<8x8xbf16> to vector<1x8x8xbf16>
    tpu.vector_store %arg27[%c1, %c0_8, %c0_9], %21 {strides = array<i32>} : memref<4x8x8xbf16, #tpu.memory_space<vmem>>, vector<1x8x8xbf16>,
    %22 = vector.extract_strided_slice %13 {offsets = [0, 16], sizes = [8, 8], strides = [1, 1]} : vector<8x32xbf16> to vector<8x8xbf16>
    %c2 = arith.constant 2 : index
    %c0_10 = arith.constant 0 : index
    %c0_11 = arith.constant 0 : index
    %23 = vector.load %arg27[%c2, %c0_10, %c0_11] : memref<4x8x8xbf16, #tpu.memory_space<vmem>>, vector<1x8x8xbf16>
    %24 = vector.shape_cast %23 : vector<1x8x8xbf16> to vector<8x8xbf16>
    %25 = vector.shape_cast %22 : vector<8x8xbf16> to vector<1x8x8xbf16>
    tpu.vector_store %arg27[%c2, %c0_10, %c0_11], %25 {strides = array<i32>} : memref<4x8x8xbf16, #tpu.memory_space<vmem>>, vector<1x8x8xbf16>,
    %26 = vector.extract_strided_slice %13 {offsets = [0, 24], sizes = [8, 8], strides = [1, 1]} : vector<8x32xbf16> to vector<8x8xbf16>
    %c3 = arith.constant 3 : index
    %c0_12 = arith.constant 0 : index
    %c0_13 = arith.constant 0 : index
    %27 = vector.load %arg27[%c3, %c0_12, %c0_13] : memref<4x8x8xbf16, #tpu.memory_space<vmem>>, vector<1x8x8xbf16>
    %28 = vector.shape_cast %27 : vector<1x8x8xbf16> to vector<8x8xbf16>
    %29 = vector.shape_cast %26 : vector<8x8xbf16> to vector<1x8x8xbf16>
    tpu.vector_store %arg27[%c3, %c0_12, %c0_13], %29 {strides = array<i32>} : memref<4x8x8xbf16, #tpu.memory_space<vmem>>, vector<1x8x8xbf16>,
    %c0_14 = arith.constant 0 : index
    %c0_15 = arith.constant 0 : index
    %c0_16 = arith.constant 0 : index
    %30 = vector.load %arg27[%c0_14, %c0_15, %c0_16] : memref<4x8x8xbf16, #tpu.memory_space<vmem>>, vector<4x8x8xbf16>
    %c0_17 = arith.constant 0 : index
    %c0_18 = arith.constant 0 : index
    %c0_19 = arith.constant 0 : index
    %31 = vector.load %arg25[%c0_17, %c0_18, %c0_19] : memref<4x8x8xbf16, #tpu.memory_space<vmem>>, vector<4x8x8xbf16>
    %cst_20 = arith.constant dense<0.000000e+00> : vector<4x8x8xf32>
    %32 = tpu.matmul %30, %31, %cst_20 {dimension_numbers = #tpu.dot_dimension_numbers<[2], [2], [1], [1], [0, 0, 0, 1, 1, 1], [0], [0]>} : vector<4x8x8xbf16>, vector<4x8x8xbf16>, vector<4x8x8xf32> -> vector<4x8x8xf32>
    %c0_21 = arith.constant 0 : index
    %c0_22 = arith.constant 0 : index
    %c0_23 = arith.constant 0 : index
    %33 = vector.load %arg3[%c0_21, %c0_22, %c0_23] : memref<1x1x8xf32, #tpu.memory_space<vmem>>, vector<1x1x8xf32>
    %34 = vector.broadcast %33 : vector<1x1x8xf32> to vector<4x8x8xf32>
    %35 = arith.addf %32, %34 : vector<4x8x8xf32>
    %cst_24 = arith.constant dense<0xFF800000> : vector<4x8xf32>
    %36 = vector.multi_reduction <maximumf>, %35, %cst_24 [2] : vector<4x8x8xf32> to vector<4x8xf32>
    %37 = vector.shape_cast %36 : vector<4x8xf32> to vector<4x8x1xf32>
    %38 = vector.broadcast %37 : vector<4x8x1xf32> to vector<4x8x8xf32>
    %39 = arith.subf %35, %38 : vector<4x8x8xf32>
    %40 = math.exp %39 : vector<4x8x8xf32>
    %cst_25 = arith.constant dense<0.000000e+00> : vector<4x8xf32>
    %41 = vector.multi_reduction <add>, %40, %cst_25 [2] : vector<4x8x8xf32> to vector<4x8xf32>
    %42 = vector.shape_cast %41 : vector<4x8xf32> to vector<4x8x1xf32>
    %43 = tpu.reciprocal %42 {approx = true} : vector<4x8x1xf32> -> vector<4x8x1xf32>
    %44 = vector.broadcast %43 : vector<4x8x1xf32> to vector<4x8x8xf32>
    %45 = arith.mulf %40, %44 : vector<4x8x8xf32>
    %46 = arith.truncf %45 : vector<4x8x8xf32> to vector<4x8x8xbf16>
    %c0_26 = arith.constant 0 : index
    %c0_27 = arith.constant 0 : index
    %c0_28 = arith.constant 0 : index
    %47 = vector.load %arg26[%c0_26, %c0_27, %c0_28] : memref<4x8x8xbf16, #tpu.memory_space<vmem>>, vector<4x8x8xbf16>
    %cst_29 = arith.constant dense<0.000000e+00> : vector<4x8x8xf32>
    %48 = tpu.matmul %46, %47, %cst_29 {dimension_numbers = #tpu.dot_dimension_numbers<[2], [1], [1], [2], [0, 0, 0, 1, 1, 2], [0], [0]>} : vector<4x8x8xbf16>, vector<4x8x8xbf16>, vector<4x8x8xf32> -> vector<4x8x8xf32>
    %49 = vector.extract_strided_slice %48 {offsets = [0, 0, 0], sizes = [1, 8, 8], strides = [1, 1, 1]} : vector<4x8x8xf32> to vector<1x8x8xf32>
    %50 = vector.shape_cast %49 : vector<1x8x8xf32> to vector<8x8xf32>
    %51 = arith.truncf %50 : vector<8x8xf32> to vector<8x8xbf16>
    %c0_30 = arith.constant 0 : index
    %c0_31 = arith.constant 0 : index
    %52 = vector.load %arg28[%c0_30, %c0_31] : memref<8x32xbf16, #tpu.memory_space<vmem>>, vector<8x8xbf16>
    tpu.vector_store %arg28[%c0_30, %c0_31], %51 {strides = array<i32>} : memref<8x32xbf16, #tpu.memory_space<vmem>>, vector<8x8xbf16>,
    %53 = vector.extract_strided_slice %48 {offsets = [1, 0, 0], sizes = [1, 8, 8], strides = [1, 1, 1]} : vector<4x8x8xf32> to vector<1x8x8xf32>
    %54 = vector.shape_cast %53 : vector<1x8x8xf32> to vector<8x8xf32>
    %55 = arith.truncf %54 : vector<8x8xf32> to vector<8x8xbf16>
    %c0_32 = arith.constant 0 : index
    %c8 = arith.constant 8 : index
    %56 = vector.load %arg28[%c0_32, %c8] : memref<8x32xbf16, #tpu.memory_space<vmem>>, vector<8x8xbf16>
    tpu.vector_store %arg28[%c0_32, %c8], %55 {strides = array<i32>} : memref<8x32xbf16, #tpu.memory_space<vmem>>, vector<8x8xbf16>,
    %57 = vector.extract_strided_slice %48 {offsets = [2, 0, 0], sizes = [1, 8, 8], strides = [1, 1, 1]} : vector<4x8x8xf32> to vector<1x8x8xf32>
    %58 = vector.shape_cast %57 : vector<1x8x8xf32> to vector<8x8xf32>
    %59 = arith.truncf %58 : vector<8x8xf32> to vector<8x8xbf16>
    %c0_33 = arith.constant 0 : index
    %c16 = arith.constant 16 : index
    %60 = vector.load %arg28[%c0_33, %c16] : memref<8x32xbf16, #tpu.memory_space<vmem>>, vector<8x8xbf16>
    tpu.vector_store %arg28[%c0_33, %c16], %59 {strides = array<i32>} : memref<8x32xbf16, #tpu.memory_space<vmem>>, vector<8x8xbf16>,
    %61 = vector.extract_strided_slice %48 {offsets = [3, 0, 0], sizes = [1, 8, 8], strides = [1, 1, 1]} : vector<4x8x8xf32> to vector<1x8x8xf32>
    %62 = vector.shape_cast %61 : vector<1x8x8xf32> to vector<8x8xf32>
    %63 = arith.truncf %62 : vector<8x8xf32> to vector<8x8xbf16>
    %c0_34 = arith.constant 0 : index
    %c24 = arith.constant 24 : index
    %64 = vector.load %arg28[%c0_34, %c24] : memref<8x32xbf16, #tpu.memory_space<vmem>>, vector<8x8xbf16>
    tpu.vector_store %arg28[%c0_34, %c24], %63 {strides = array<i32>} : memref<8x32xbf16, #tpu.memory_space<vmem>>, vector<8x8xbf16>,
    %c0_35 = arith.constant 0 : index
    %c0_36 = arith.constant 0 : index
    %65 = vector.load %arg28[%c0_35, %c0_36] : memref<8x32xbf16, #tpu.memory_space<vmem>>, vector<8x32xbf16>
    %c0_37 = arith.constant 0 : index
    %c0_38 = arith.constant 0 : index
    %66 = vector.load %arg13[%c0_37, %c0_38] : memref<32x32xbf16, #tpu.memory_space<vmem>>, vector<32x32xbf16>
    %cst_39 = arith.constant dense<0.000000e+00> : vector<8x32xf32>
    %67 = tpu.matmul %65, %66, %cst_39 {dimension_numbers = #tpu.dot_dimension_numbers<[1], [0], [0], [1], [0, 0, 1, 1], [], []>} : vector<8x32xbf16>, vector<32x32xbf16>, vector<8x32xf32> -> vector<8x32xf32>
    %c0_40 = arith.constant 0 : index
    %c0_41 = arith.constant 0 : index
    %68 = vector.load %arg14[%c0_40, %c0_41] : memref<1x32xf32, #tpu.memory_space<vmem>>, vector<1x32xf32>
    %69 = vector.broadcast %68 : vector<1x32xf32> to vector<8x32xf32>
    %70 = arith.addf %67, %69 : vector<8x32xf32>
    %71 = arith.addf %6, %70 : vector<8x32xf32>
    %c0_42 = arith.constant 0 : index
    %c0_43 = arith.constant 0 : index
    %72 = vector.load %arg15[%c0_42, %c0_43] : memref<1x32xf32, #tpu.memory_space<vmem>>, vector<1x32xf32>
    %c0_44 = arith.constant 0 : index
    %c0_45 = arith.constant 0 : index
    %73 = vector.load %arg16[%c0_44, %c0_45] : memref<1x32xf32, #tpu.memory_space<vmem>>, vector<1x32xf32>
    %cst_46 = arith.constant dense<0.000000e+00> : vector<8xf32>
    %74 = vector.multi_reduction <add>, %71, %cst_46 [1] : vector<8x32xf32> to vector<8xf32>
    %75 = vector.shape_cast %74 : vector<8xf32> to vector<8x1xf32>
    %cst_47 = arith.constant 3.200000e+01 : f32
    %76 = vector.broadcast %cst_47 : f32 to vector<8x1xf32>
    %77 = arith.divf %75, %76 : vector<8x1xf32>
    %78 = vector.broadcast %77 : vector<8x1xf32> to vector<8x32xf32>
    %79 = arith.subf %71, %78 : vector<8x32xf32>
    %80 = arith.mulf %79, %79 : vector<8x32xf32>
    %cst_48 = arith.constant dense<0.000000e+00> : vector<8xf32>
    %81 = vector.multi_reduction <add>, %80, %cst_48 [1] : vector<8x32xf32> to vector<8xf32>
    %82 = vector.shape_cast %81 : vector<8xf32> to vector<8x1xf32>
    %cst_49 = arith.constant 3.200000e+01 : f32
    %83 = vector.broadcast %cst_49 : f32 to vector<8x1xf32>
    %84 = arith.divf %82, %83 : vector<8x1xf32>
    %85 = vector.broadcast %77 : vector<8x1xf32> to vector<8x32xf32>
    %86 = arith.subf %71, %85 : vector<8x32xf32>
    %cst_50 = arith.constant 9.99999974E-6 : f32
    %87 = vector.broadcast %cst_50 : f32 to vector<8x1xf32>
    %88 = arith.addf %84, %87 : vector<8x1xf32>
    %89 = math.rsqrt %88 : vector<8x1xf32>
    %90 = vector.broadcast %89 : vector<8x1xf32> to vector<8x32xf32>
    %91 = arith.mulf %86, %90 : vector<8x32xf32>
    %92 = vector.broadcast %72 : vector<1x32xf32> to vector<8x32xf32>
    %93 = arith.mulf %91, %92 : vector<8x32xf32>
    %94 = vector.broadcast %73 : vector<1x32xf32> to vector<8x32xf32>
    %95 = arith.addf %93, %94 : vector<8x32xf32>
    %96 = arith.truncf %95 : vector<8x32xf32> to vector<8x32xbf16>
    %c0_51 = arith.constant 0 : index
    %c0_52 = arith.constant 0 : index
    %97 = vector.load %arg17[%c0_51, %c0_52] : memref<32x64xbf16, #tpu.memory_space<vmem>>, vector<32x64xbf16>
    %cst_53 = arith.constant dense<0.000000e+00> : vector<8x64xf32>
    %98 = tpu.matmul %96, %97, %cst_53 {dimension_numbers = #tpu.dot_dimension_numbers<[1], [0], [0], [1], [0, 0, 1, 1], [], []>} : vector<8x32xbf16>, vector<32x64xbf16>, vector<8x64xf32> -> vector<8x64xf32>
    %c0_54 = arith.constant 0 : index
    %c0_55 = arith.constant 0 : index
    %99 = vector.load %arg18[%c0_54, %c0_55] : memref<1x64xf32, #tpu.memory_space<vmem>>, vector<1x64xf32>
    %100 = vector.broadcast %99 : vector<1x64xf32> to vector<8x64xf32>
    %101 = arith.addf %98, %100 : vector<8x64xf32>
    %cst_56 = arith.constant 0.000000e+00 : f32
    %102 = vector.broadcast %cst_56 : f32 to vector<8x64xf32>
    %103 = arith.maximumf %101, %102 : vector<8x64xf32>
    %104 = arith.truncf %103 : vector<8x64xf32> to vector<8x64xbf16>
    %c0_57 = arith.constant 0 : index
    %c0_58 = arith.constant 0 : index
    %105 = vector.load %arg19[%c0_57, %c0_58] : memref<64x32xbf16, #tpu.memory_space<vmem>>, vector<64x32xbf16>
    %cst_59 = arith.constant dense<0.000000e+00> : vector<8x32xf32>
    %106 = tpu.matmul %104, %105, %cst_59 {dimension_numbers = #tpu.dot_dimension_numbers<[1], [0], [0], [1], [0, 0, 1, 1], [], []>} : vector<8x64xbf16>, vector<64x32xbf16>, vector<8x32xf32> -> vector<8x32xf32>
    %c0_60 = arith.constant 0 : index
    %c0_61 = arith.constant 0 : index
    %107 = vector.load %arg20[%c0_60, %c0_61] : memref<1x32xf32, #tpu.memory_space<vmem>>, vector<1x32xf32>
    %108 = vector.broadcast %107 : vector<1x32xf32> to vector<8x32xf32>
    %109 = arith.addf %106, %108 : vector<8x32xf32>
    %110 = arith.addf %95, %109 : vector<8x32xf32>
    %c0_62 = arith.constant 0 : index
    %c0_63 = arith.constant 0 : index
    %111 = vector.load %arg21[%c0_62, %c0_63] : memref<1x32xf32, #tpu.memory_space<vmem>>, vector<1x32xf32>
    %c0_64 = arith.constant 0 : index
    %c0_65 = arith.constant 0 : index
    %112 = vector.load %arg22[%c0_64, %c0_65] : memref<1x32xf32, #tpu.memory_space<vmem>>, vector<1x32xf32>
    %cst_66 = arith.constant dense<0.000000e+00> : vector<8xf32>
    %113 = vector.multi_reduction <add>, %110, %cst_66 [1] : vector<8x32xf32> to vector<8xf32>
    %114 = vector.shape_cast %113 : vector<8xf32> to vector<8x1xf32>
    %cst_67 = arith.constant 3.200000e+01 : f32
    %115 = vector.broadcast %cst_67 : f32 to vector<8x1xf32>
    %116 = arith.divf %114, %115 : vector<8x1xf32>
    %117 = vector.broadcast %116 : vector<8x1xf32> to vector<8x32xf32>
    %118 = arith.subf %110, %117 : vector<8x32xf32>
    %119 = arith.mulf %118, %118 : vector<8x32xf32>
    %cst_68 = arith.constant dense<0.000000e+00> : vector<8xf32>
    %120 = vector.multi_reduction <add>, %119, %cst_68 [1] : vector<8x32xf32> to vector<8xf32>
    %121 = vector.shape_cast %120 : vector<8xf32> to vector<8x1xf32>
    %cst_69 = arith.constant 3.200000e+01 : f32
    %122 = vector.broadcast %cst_69 : f32 to vector<8x1xf32>
    %123 = arith.divf %121, %122 : vector<8x1xf32>
    %124 = vector.broadcast %116 : vector<8x1xf32> to vector<8x32xf32>
    %125 = arith.subf %110, %124 : vector<8x32xf32>
    %cst_70 = arith.constant 9.99999974E-6 : f32
    %126 = vector.broadcast %cst_70 : f32 to vector<8x1xf32>
    %127 = arith.addf %123, %126 : vector<8x1xf32>
    %128 = math.rsqrt %127 : vector<8x1xf32>
    %129 = vector.broadcast %128 : vector<8x1xf32> to vector<8x32xf32>
    %130 = arith.mulf %125, %129 : vector<8x32xf32>
    %131 = vector.broadcast %111 : vector<1x32xf32> to vector<8x32xf32>
    %132 = arith.mulf %130, %131 : vector<8x32xf32>
    %133 = vector.broadcast %112 : vector<1x32xf32> to vector<8x32xf32>
    %134 = arith.addf %132, %133 : vector<8x32xf32>
    %c0_71 = arith.constant 0 : index
    %c0_72 = arith.constant 0 : index
    %c0_73 = arith.constant 0 : index
    %135 = vector.load %arg23[%c0_71, %c0_72, %c0_73] : memref<1x8x32xf32, #tpu.memory_space<vmem>>, vector<1x8x32xf32>
    %136 = vector.shape_cast %135 : vector<1x8x32xf32> to vector<8x32xf32>
    %137 = vector.shape_cast %134 : vector<8x32xf32> to vector<1x8x32xf32>
    tpu.vector_store %arg23[%c0_71, %c0_72, %c0_73], %137 {strides = array<i32>} : memref<1x8x32xf32, #tpu.memory_space<vmem>>, vector<1x8x32xf32>,
    return
  }
  func.func @transform_0(%arg0: i32, %arg1: i32) -> (i32, i32, i32) {
    %c0_i32 = arith.constant 0 : i32
    %c0_i32_0 = arith.constant 0 : i32
    %c0_i32_1 = arith.constant 0 : i32
    return %arg0, %c0_i32, %c0_i32_0 : i32, i32, i32
  }
  func.func @transform_1(%arg0: i32, %arg1: i32) -> (i32, i32, i32) {
    %c0_i32 = arith.constant 0 : i32
    %c0_i32_0 = arith.constant 0 : i32
    %c0_i32_1 = arith.constant 0 : i32
    return %arg0, %c0_i32, %c0_i32_0 : i32, i32, i32
  }
  func.func @transform_2(%arg0: i32, %arg1: i32) -> (i32, i32) {
    %c0_i32 = arith.constant 0 : i32
    %c0_i32_0 = arith.constant 0 : i32
    %c0_i32_1 = arith.constant 0 : i32
    return %c0_i32, %c0_i32_0 : i32, i32
  }
  func.func @transform_3(%arg0: i32, %arg1: i32) -> (i32, i32) {
    %c0_i32 = arith.constant 0 : i32
    %c0_i32_0 = arith.constant 0 : i32
    %c0_i32_1 = arith.constant 0 : i32
    return %c0_i32, %c0_i32_0 : i32, i32
  }
  func.func @transform_4(%arg0: i32, %arg1: i32) -> (i32, i32) {
    %c0_i32 = arith.constant 0 : i32
    %c0_i32_0 = arith.constant 0 : i32
    %c0_i32_1 = arith.constant 0 : i32
    return %c0_i32, %c0_i32_0 : i32, i32
  }
  func.func @transform_5(%arg0: i32, %arg1: i32) -> (i32, i32) {
    %c0_i32 = arith.constant 0 : i32
    %c0_i32_0 = arith.constant 0 : i32
    %c0_i32_1 = arith.constant 0 : i32
    return %c0_i32, %c0_i32_0 : i32, i32
  }
  func.func @transform_6(%arg0: i32, %arg1: i32) -> (i32, i32) {
    %c0_i32 = arith.constant 0 : i32
    %c0_i32_0 = arith.constant 0 : i32
    %c0_i32_1 = arith.constant 0 : i32
    return %c0_i32, %c0_i32_0 : i32, i32
  }
  func.func @transform_7(%arg0: i32, %arg1: i32) -> (i32, i32) {
    %c0_i32 = arith.constant 0 : i32
    %c0_i32_0 = arith.constant 0 : i32
    %c0_i32_1 = arith.constant 0 : i32
    return %c0_i32, %c0_i32_0 : i32, i32
  }
  func.func @transform_8(%arg0: i32, %arg1: i32) -> (i32, i32) {
    %c0_i32 = arith.constant 0 : i32
    %c0_i32_0 = arith.constant 0 : i32
    %c0_i32_1 = arith.constant 0 : i32
    return %c0_i32, %c0_i32_0 : i32, i32
  }
  func.func @transform_9(%arg0: i32, %arg1: i32) -> (i32, i32) {
    %c0_i32 = arith.constant 0 : i32
    %c0_i32_0 = arith.constant 0 : i32
    %c0_i32_1 = arith.constant 0 : i32
    return %c0_i32, %c0_i32_0 : i32, i32
  }
  func.func @transform_10(%arg0: i32, %arg1: i32) -> (i32, i32) {
    %c0_i32 = arith.constant 0 : i32
    %c0_i32_0 = arith.constant 0 : i32
    %c0_i32_1 = arith.constant 0 : i32
    return %c0_i32, %c0_i32_0 : i32, i32
  }
  func.func @transform_11(%arg0: i32, %arg1: i32) -> (i32, i32) {
    %c0_i32 = arith.constant 0 : i32
    %c0_i32_0 = arith.constant 0 : i32
    %c0_i32_1 = arith.constant 0 : i32
    return %c0_i32, %c0_i32_0 : i32, i32
  }
  func.func @transform_12(%arg0: i32, %arg1: i32) -> (i32, i32) {
    %c0_i32 = arith.constant 0 : i32
    %c0_i32_0 = arith.constant 0 : i32
    %c0_i32_1 = arith.constant 0 : i32
    return %c0_i32, %c0_i32_0 : i32, i32
  }
  func.func @transform_13(%arg0: i32, %arg1: i32) -> (i32, i32) {
    %c0_i32 = arith.constant 0 : i32
    %c0_i32_0 = arith.constant 0 : i32
    %c0_i32_1 = arith.constant 0 : i32
    return %c0_i32, %c0_i32_0 : i32, i32
  }
  func.func @transform_14(%arg0: i32, %arg1: i32) -> (i32, i32) {
    %c0_i32 = arith.constant 0 : i32
    %c0_i32_0 = arith.constant 0 : i32
    %c0_i32_1 = arith.constant 0 : i32
    return %c0_i32, %c0_i32_0 : i32, i32
  }
  func.func @transform_15(%arg0: i32, %arg1: i32) -> (i32, i32) {
    %c0_i32 = arith.constant 0 : i32
    %c0_i32_0 = arith.constant 0 : i32
    %c0_i32_1 = arith.constant 0 : i32
    return %c0_i32, %c0_i32_0 : i32, i32
  }
  func.func @transform_16(%arg0: i32, %arg1: i32) -> (i32, i32) {
    %c0_i32 = arith.constant 0 : i32
    %c0_i32_0 = arith.constant 0 : i32
    %c0_i32_1 = arith.constant 0 : i32
    return %c0_i32, %c0_i32_0 : i32, i32
  }
  func.func @transform_17(%arg0: i32, %arg1: i32) -> (i32, i32) {
    %c0_i32 = arith.constant 0 : i32
    %c0_i32_0 = arith.constant 0 : i32
    %c0_i32_1 = arith.constant 0 : i32
    return %c0_i32, %c0_i32_0 : i32, i32
  }
  func.func @transform_18(%arg0: i32, %arg1: i32) -> (i32, i32) {
    %c0_i32 = arith.constant 0 : i32
    %c0_i32_0 = arith.constant 0 : i32
    %c0_i32_1 = arith.constant 0 : i32
    return %c0_i32, %c0_i32_0 : i32, i32
  }
  func.func @transform_19(%arg0: i32, %arg1: i32) -> (i32, i32) {
    %c0_i32 = arith.constant 0 : i32
    %c0_i32_0 = arith.constant 0 : i32
    %c0_i32_1 = arith.constant 0 : i32
    return %c0_i32, %c0_i32_0 : i32, i32
  }
  func.func @transform_20(%arg0: i32, %arg1: i32) -> (i32, i32) {
    %c0_i32 = arith.constant 0 : i32
    %c0_i32_0 = arith.constant 0 : i32
    %c0_i32_1 = arith.constant 0 : i32
    return %c0_i32, %c0_i32_0 : i32, i32
  }
  func.func @transform_21(%arg0: i32, %arg1: i32) -> (i32, i32, i32) {
    %c0_i32 = arith.constant 0 : i32
    %c0_i32_0 = arith.constant 0 : i32
    return %arg0, %arg1, %c0_i32 : i32, i32, i32
  }
}

</mosaic_0001>

<bundles_post_ra>
// kernel: tpu_custom_call.1
= control target key start
LH: loop header
LB: loop body
LE: loop exit
PB: predicated region body
PF: predicated region fallthrough
CT: control target
= control target key end

     0   :  { %s3175_s0 = inlined_call_operand.vmem [shape: f32[2,8,32], index: 0, kind: input, shape index: {}]   ;;  %s3176_s1 = inlined_call_operand.hbm [shape: f32[2,1,8], index: 1, kind: input, shape index: {}]   ;;  %s3177_s2 = inlined_call_operand.hbm [shape: f32[8,32], index: 2, kind: input, shape index: {}]   ;;  %s3178_s3 = inlined_call_operand.hbm [shape: f32[1,32], index: 3, kind: input, shape index: {}]   ;;  %s3179_s4 = inlined_call_operand.hbm [shape: f32[1,32], index: 4, kind: input, shape index: {}]   ;;  %s3180_s5 = inlined_call_operand.vmem [shape: bf16[32,32], index: 5, kind: input, shape index: {}]   ;;  %s3181_s6 = inlined_call_operand.vmem [shape: bf16[32,32], index: 6, kind: input, shape index: {}]   ;;  %s3182_s7 = inlined_call_operand.hbm [shape: bf16[32,32], index: 7, kind: input, shape index: {}]   ;;  %s3183_s8 = inlined_call_operand.hbm [shape: f32[1,32], index: 8, kind: input, shape index: {}]   ;;  %s3184_s9 = inlined_call_operand.hbm [shape: f32[1,32], index: 9, kind: input, shape index: {}]   ;;  %s3185_s10 = inlined_call_operand.hbm [shape: f32[1,32], index: 10, kind: input, shape index: {}]   ;;  %s3186_s11 = inlined_call_operand.hbm [shape: bf16[32,32], index: 11, kind: input, shape index: {}]   ;;  %s3187_s12 = inlined_call_operand.hbm [shape: f32[1,32], index: 12, kind: input, shape index: {}]   ;;  %s3188_s13 = inlined_call_operand.hbm [shape: f32[1,32], index: 13, kind: input, shape index: {}]   ;;  %s3189_s14 = inlined_call_operand.hbm [shape: f32[1,32], index: 14, kind: input, shape index: {}]   ;;  %s3190_s15 = inlined_call_operand.hbm [shape: bf16[32,64], index: 15, kind: input, shape index: {}]   ;;  %s3191_s16 = inlined_call_operand.hbm [shape: f32[1,64], index: 16, kind: input, shape index: {}]   ;;  %s3192_s17 = inlined_call_operand.vmem [shape: bf16[64,32], index: 17, kind: input, shape index: {}]   ;;  %s3193_s18 = inlined_call_operand.vmem [shape: f32[1,32], index: 18, kind: input, shape index: {}]   ;;  %s3194_s19 = inlined_call_operand.vmem [shape: f32[1,32], index: 19, kind: input, shape index: {}]   ;;  %s3195_s20 = inlined_call_operand.vmem [shape: f32[1,32], index: 20, kind: input, shape index: {}]   ;;  %s3196_s21 = inlined_call_operand.hbm [shape: f32[2,8,32], index: 21, kind: output, shape index: {}]  }
   0x1   :  { %3206 = sst [smem:[#allocation41_spill]] %s3175_s0 }
   0x2   :  { %3207 = sst [smem:[#allocation42_spill]] %s3176_s1 }
   0x3   :  { %3208 = sst [smem:[#allocation43_spill]] %s3177_s2 }
   0x4   :  { %3209 = sst [smem:[#allocation44_spill]] %s3178_s3 }
   0x5   :  { %3210 = sst [smem:[#allocation45_spill]] %s3179_s4 }
   0x6   :  { %3211 = sst [smem:[#allocation46_spill]] %s3180_s5 }
   0x7   :  { %3212 = sst [smem:[#allocation47_spill]] %s3181_s6 }
   0x8   :  { %3213 = sst [smem:[#allocation48_spill]] %s3182_s7 }
   0x9   :  { %3214 = sst [smem:[#allocation49_spill]] %s3183_s8 }
   0xa   :  { %3215 = sst [smem:[#allocation50_spill]] %s3184_s9 }
   0xb   :  { %3216 = sst [smem:[#allocation51_spill]] %s3185_s10 }
   0xc   :  { %3217 = sst [smem:[#allocation52_spill]] %s3192_s17 }
   0xd   :  { %3218 = sst [smem:[#allocation53_spill]] %s3193_s18 }
   0xe   :  { %3219 = sst [smem:[#allocation54_spill]] %s3194_s19 }
   0xf   :  { %3220 = sst [smem:[#allocation55_spill]] %s3195_s20 }
  0x10   :  { %3221 = sst [smem:[#allocation56_spill]] %s3196_s21 }
  0x11   :  { %26 = vsyncpa [#allocation8], 0 }
  0x12   :  { %28 = vsyncpa [#allocation8 + $0x1], 0 }
  0x13   :  { %29 = vsyncpa [#allocation11], 0 }
  0x14   :  { %30 = vsyncpa [#allocation14], 0 }
  0x15   :  { %31 = vsyncpa [#allocation17], 0 }
  0x16   :  { %32 = vsyncpa [#allocation20], 0 }
  0x17   :  { %33 = vsyncpa [#allocation23], 0 }
  0x18   :  { %34 = vsyncpa [#allocation26], 0 }
  0x19   :  { %35 = vsyncpa [#allocation29], 0 }
  0x1a   :  { %36 = vsyncpa [#allocation9], 0 }
  0x1b   :  { %38 = vsyncpa [#allocation9 + $0x1], 0  ;;  %s2810_s2 = smov 0   ;;  %s2812_s25 = smov 0  }
  0x1c   :  { %s2814_s26 = smov 0   ;;  %s2816_s27 = smov 0  }
  0x1d   :  { %s2818_s3 = smov 0   ;;  %s2820_s28 = smov 0  }
  0x1e LB: > { %3222 = sst [smem:[#allocation40_spill]] %s2668_s27  ;;  %s3198_s29 = sadd.s32 4294967295, %s2676_s28   ;;  %s2676_s28 = sphi %s2820_s28, %s44_s28   ;;  %s2672_s3 = sphi %s2818_s3, %s3252_s3   ;;  %s2668_s27 = sphi %s2816_s27, %s3251_s27   ;;  %s2664_s26 = sphi %s2814_s26, %s3250_s26   ;;  %s2660_s25 = sphi %s2812_s25, %s3249_s25   ;;  %s2656_s2 = sphi %s2810_s2, %s3248_s2  }
  0x1f   : > { %p1788_p0 = scmp.ge.s32.totalorder %s2676_s28, 1  ;;  %p2844_p1 = scmp.eq.s32.totalorder %s3198_s29, 0 }
  0x20   : > { %p540_p2 = scmp.lt.s32.totalorder %s2676_s28, 3  ;;  %s3224_s5 = sld [smem:[#allocation43_spill]] }
  0x21   : > { %p1802_p4 = scmp.ge.s32.totalorder %s2676_s28, 2  ;;  %s2678_s1 = smov [#allocation10]  }
  0x22   : > { %p2852_p3 = pnand %p1788_p0, %p540_p2  ;;  %s554_s24 = sshll.u32 %s2678_s1, 4  ;;  %s555_s24 = int_to_ptr.vmem [resolvable:$true] %s554_s24 }
  0x23   : > { %s3226_s21 = sld [smem:[#allocation45_spill]]  ;;  %s2679_s17 = smov [#allocation13]  }
  0x24   : > { %p1963_p5 = pneg %p2852_p3  ;;  %s3228_s8 = sld [smem:[#allocation49_spill]] }
  0x25   : > { %s578_s1 = sshll.u32 %s2679_s17, 4  ;;  %s3229_s10 = sld [smem:[#allocation51_spill]]  ;;  %s579_s1 = int_to_ptr.vmem [resolvable:$true] %s578_s1 }
  0x26   : > { %s552_s22 = sshll.u32 %s3224_s5, 4  ;;  %p2864_p6 = pnand %p1963_p5, %p2844_p1  ;;  %s553_s22 = int_to_ptr.hbm [resolvable:$true] %s552_s22 }
  0x27   : > { %s2680_s6 = smov [#allocation16]   ;;  %s2681_s30 = smov [#allocation19]  }
  0x28   : > { %1966 = dma.hbm_to_vmem [thread:$0]  (!%p2864_p6), %s553_s22, 128, %s555_s24, [#allocation11]  }
  0x29   : > { %s576_s19 = sshll.u32 %s3226_s21, 4  ;;  %s610_s27 = sshll.u32 %s2680_s6, 4  ;;  %s577_s19 = int_to_ptr.hbm [resolvable:$true] %s576_s19  ;;  %s611_s27 = int_to_ptr.vmem [resolvable:$true] %s610_s27 }
  0x2a   : > { %s608_s18 = sshll.u32 %s3228_s8, 4  ;;  %s634_s17 = sshll.u32 %s2681_s30, 4  ;;  %s609_s18 = int_to_ptr.hbm [resolvable:$true] %s608_s18  ;;  %s635_s17 = int_to_ptr.vmem [resolvable:$true] %s634_s17 }
  0x2b   : > { %1972 = dma.hbm_to_vmem [thread:$0]  (!%p2864_p6), %s577_s19, 16, %s579_s1, [#allocation14]  }
  0x2c   : > { %s632_s29 = sshll.u32 %s3229_s10, 4  ;;  %s658_s22 = sshll.u32 %s3187_s12, 4  ;;  %s633_s29 = int_to_ptr.hbm [resolvable:$true] %s632_s29  ;;  %s659_s22 = int_to_ptr.hbm [resolvable:$true] %s658_s22 }
  0x2d   : > { %1978 = dma.hbm_to_vmem [thread:$0]  (!%p2864_p6), %s609_s18, 16, %s611_s27, [#allocation17]  }
  0x2e   : > { %1984 = dma.hbm_to_vmem [thread:$0]  (!%p2864_p6), %s633_s29, 16, %s635_s17, [#allocation20]  }
  0x2f   : > { %s682_s1 = sshll.u32 %s3189_s14, 4  ;;  %s2682_s6 = smov [#allocation22]   ;;  %s683_s1 = int_to_ptr.hbm [resolvable:$true] %s682_s1 }
  0x30   : > { %s660_s20 = sshll.u32 %s2682_s6, 4  ;;  %s2683_s18 = smov [#allocation25]   ;;  %s661_s20 = int_to_ptr.vmem [resolvable:$true] %s660_s20 }
  0x31   : > { %1990 = dma.hbm_to_vmem [thread:$0]  (!%p2864_p6), %s659_s22, 16, %s661_s20, [#allocation23]  }
  0x32   : > { %s684_s27 = sshll.u32 %s2683_s18, 4  ;;  %s3230_s30 = sld [smem:[#allocation44_spill]]  ;;  %s685_s27 = int_to_ptr.vmem [resolvable:$true] %s684_s27 }
  0x33   : > { %1996 = dma.hbm_to_vmem [thread:$0]  (!%p2864_p6), %s683_s1, 16, %s685_s27, [#allocation26]  }
  0x34   : > { %s3231_s7 = sld [smem:[#allocation48_spill]]  ;;  %s2684_s24 = smov [#allocation12]  }
  0x35   : > { %s566_s6 = sshll.u32 %s2684_s24, 4  ;;  %s2685_s22 = smov [#allocation15]   ;;  %s567_s6 = int_to_ptr.vmem [resolvable:$true] %s566_s6 }
  0x36   : > { %s595_s20 = sshll.u32 %s2685_s22, 4  ;;  %s2686_s18 = smov 64   ;;  %s596_s20 = int_to_ptr.vmem [resolvable:$true] %s595_s20 }
  0x37   : > { %s2687_s8 = smov 4   ;;  %s3232_s9 = sld [smem:[#allocation50_spill]] }
  0x38   : > { %s564_s5 = sshll.u32 %s3230_s30, 4  ;;  %s2688_s30 = smov [#allocation18]   ;;  %s565_s5 = int_to_ptr.hbm [resolvable:$true] %s564_s5 }
  0x39   : > { %1969 = dma.hbm_to_vmem [thread:$0]  (!%p2864_p6), %s565_s5, 16, %s567_s6, [#allocation11]  }
  0x3a   : > { %s593_s19 = sshll.u32 %s3231_s7, 4  ;;  %s622_s29 = sshll.u32 %s2688_s30, 4  ;;  %s594_s19 = int_to_ptr.hbm [resolvable:$true] %s593_s19  ;;  %s623_s29 = int_to_ptr.vmem [resolvable:$true] %s622_s29 }
  0x3b   : > { %1975 = dma.hbm_to_vmem [thread:$0]  (!%p2864_p6), %s594_s19, 256, %s596_s20, [#allocation14], %s2686_s18, %s2686_s18, %s2687_s8  }
  0x3c   : > { %s643_s24 = sshll.u32 %s3186_s11, 4  ;;  %s2689_s6 = smov [#allocation21]   ;;  %s644_s24 = int_to_ptr.hbm [resolvable:$true] %s643_s24 }
  0x3d   : > { %s620_s21 = sshll.u32 %s3232_s9, 4  ;;  %s645_s22 = sshll.u32 %s2689_s6, 4  ;;  %s621_s21 = int_to_ptr.hbm [resolvable:$true] %s620_s21  ;;  %s646_s22 = int_to_ptr.vmem [resolvable:$true] %s645_s22 }
  0x3e   : > { %1981 = dma.hbm_to_vmem [thread:$0]  (!%p2864_p6), %s621_s21, 16, %s623_s29, [#allocation17]  }
  0x3f   : > { %s670_s20 = sshll.u32 %s3188_s13, 4  ;;  %s693_s21 = sshll.u32 %s3190_s15, 4  ;;  %s671_s20 = int_to_ptr.hbm [resolvable:$true] %s670_s20  ;;  %s694_s21 = int_to_ptr.hbm [resolvable:$true] %s693_s21 }
  0x40   : > { %1987 = dma.hbm_to_vmem [thread:$0]  (!%p2864_p6), %s644_s24, 256, %s646_s22, [#allocation20], %s2686_s18, %s2686_s18, %s2687_s8  }
  0x41   : > { %s2690_s30 = smov [#allocation24]   ;;  %s2691_s7 = smov [#allocation27]  }
  0x42   : > { %s672_s29 = sshll.u32 %s2690_s30, 4  ;;  %s695_s5 = sshll.u32 %s2691_s7, 4  ;;  %s673_s29 = int_to_ptr.vmem [resolvable:$true] %s672_s29  ;;  %s696_s5 = int_to_ptr.vmem [resolvable:$true] %s695_s5 }
  0x43   : > { %1993 = dma.hbm_to_vmem [thread:$0]  (!%p2864_p6), %s671_s20, 16, %s673_s29, [#allocation23]  }
  0x44   : > { %s708_s6 = sshll.u32 %s3191_s16, 4  ;;  %s2692_s22 = smov [#allocation28]   ;;  %s709_s6 = int_to_ptr.hbm [resolvable:$true] %s708_s6 }
  0x45   : > { %1999 = dma.hbm_to_vmem [thread:$0]  (!%p2864_p6), %s694_s21, 256, %s696_s5, [#allocation26], %s2686_s18, %s2686_s18, %s2687_s8  }
  0x46   : > { %s710_s19 = sshll.u32 %s2692_s22, 4  ;;  %s1787_s20 = sadd.s32 4294967294, %s2676_s28   ;;  %s711_s19 = int_to_ptr.vmem [resolvable:$true] %s710_s19 }
  0x47   : > { %2002 = dma.hbm_to_vmem [thread:$0]  (!%p2864_p6), %s709_s6, 16, %s711_s19, [#allocation29]  }
  0x48   : > { %s56_s1 = sadd.s32 1, %s2672_s3  ;;  %s89_s27 = sadd.s32 1, %s2664_s26 }
  0x49   : > { %p58_p7 = scmp.ge.s32.totalorder %s56_s1, 2  ;;  %p96_p8 = scmp.ne.s32.totalorder %s2664_s26, %s2660_s25 }
  0x4a   : > { %p97_p9 = scmp.eq.s32.totalorder %s2676_s28, 0  ;;  %p102_p10 = scmp.ne.s32.totalorder %s2660_s25, %s2656_s2 }
  0x4b   : > { %s3254_s1 = smov (%p58_p7, %s56_s1), 0  ;;  %s3235_s21 = sadd.s32 4294967295, %s2676_s28  }
  0x4c   : > { %p2946_p11 = por %p97_p9, %p96_p8  ;;  %p2952_p12 = por %p2844_p1, %p102_p10 }
  0x4d   : > { %s86_s8 = ssub.s32 %s2672_s3, %s3254_s1  ;;  %p527_p13 = scmp.eq.s32.totalorder %s3235_s21, 1 }
  0x4e   : > { %p87_p0 = scmp.eq.s32.totalorder %s86_s8, 0  ;;  %p533_p2 = scmp.eq.s32.totalorder %s1787_s20, 1 }
  0x4f   : > { %p2960_p5 = por %p527_p13, %p96_p8  ;;  %p2024_p6 = scmp.lt.s32.totalorder %s2676_s28, 2 }
  0x50   : > { %s2966_s29 = scalar_select %p87_p0, %s2664_s26, %s89_s27  }
  0x51   : > { %p2968_p7 = por %p533_p2, %p102_p10  ;;  %s740_s5 = sand.u32 1, %s2664_s26  }
  0x52   : > { %s3238_s6 = sld [smem:[#allocation42_spill]]  ;;  %s743_s19 = scalar_lea.vmem [#allocation7], %s740_s5 }
  0x53   : > { %s750_s21 = sshll.u32 %s743_s19, 4  ;;  %p2004_p8 = pnand %p2024_p6, %p2946_p11  ;;  %s751_s21 = int_to_ptr.vmem [resolvable:$true] %s750_s21 }
  0x54   : > { %s741_s20 = scalar_lea.sflag [#allocation8], %s740_s5  ;;  %s2982_s27 = sand.u32 (!%p2852_p3), 1, %s2660_s25  }
  0x55   : > { %s762_s17 = scalar_lea.sflag (!%p2852_p3), [#allocation8], %s2982_s27  ;;  %s764_s24 = scalar_lea.vmem (!%p2852_p3), [#allocation7], %s2982_s27 }
  0x56   : > { %759 = sbr.rel (%p2852_p3) target bundleno = 2280 (0x8e8), region = 104 }
  0x58   : > { %s746_s22 = scalar_lea.hbm %s3238_s6, %s2672_s3 }
  0x59   : > { %s748_s8 = sshll.u32 %s746_s22, 4  ;;  %s749_s8 = int_to_ptr.hbm [resolvable:$true] %s748_s8 }
  0x5a   : > { %2006 = dma.hbm_to_vmem [thread:$0]  (!%p2004_p8), %s749_s8, 16, %s751_s21, %s741_s20  }
  0x5b   : > { %2619 = dma.done.wait (%p2952_p12), %s762_s17, 16  }
  0x5c   : > { %2621 = vsyncadd (%p2952_p12), %s762_s17, 4294967280 }
  0x5d   : > { %2623 = dma.done.wait (%p2844_p1), [#allocation11], 144  }
  0x5e   : > { %2625 = vsyncadd (%p2844_p1), [#allocation11], 4294967152 }
  0x5f   : > { %2627 = dma.done.wait (%p2844_p1), [#allocation14], 272  }
  0x60   : > { %2629 = vsyncadd (%p2844_p1), [#allocation14], 4294967024 }
  0x61   : > { %2631 = dma.done.wait (%p2844_p1), [#allocation17], 32  }
  0x62   : > { %2633 = vsyncadd (%p2844_p1), [#allocation17], 4294967264 }
  0x63   : > { %2635 = dma.done.wait (%p2844_p1), [#allocation20], 272  }
  0x64   : > { %2637 = vsyncadd (%p2844_p1), [#allocation20], 4294967024 }
  0x65   : > { %2639 = dma.done.wait (%p2844_p1), [#allocation23], 32  }
  0x66   : > { %2641 = vsyncadd (%p2844_p1), [#allocation23], 4294967264 }
  0x67   : > { %2643 = dma.done.wait (%p2844_p1), [#allocation26], 272  }
  0x68   : > { %2645 = vsyncadd (%p2844_p1), [#allocation26], 4294967024 }
  0x69   : > { %2647 = dma.done.wait (%p2844_p1), [#allocation29], 16  }
  0x6a   : > { %2649 = vsyncadd (%p2844_p1), [#allocation29], 4294967280  ;;  %s3239_s23 = sld [smem:[#allocation40_spill]]  ;;  %v902_v1 = vld [vmem:[#allocation10] sm:$0xff]  ;;  %vm906_vm0 = vcmask 261120   ;;  %v2693_v4 = vmov 32.0  }
  0x6b   : > { %s3240_s22 = sld [smem:[#allocation41_spill]]  ;;  %2122 = vrcp.f32 %v2693_v4  ;;  %v1896_v17 = vld [vmem:[#allocation15 + $0x8] sm:$0xff]  ;;  %v1895_v19 = vld [vmem:[#allocation15] sm:$0xff]  ;;  %v2109_v31 = vld [vmem:[#allocation12] ss:$0 sm:$0xff]  ;;  %vm1017_vm5 = vcmask 60416  }
  0x6c   : > { %s3241_s8 = sld [smem:[#allocation47_spill]]  ;;  %1008 = vmatpush.bf16.msra.mxu1 %v1896_v17  ;;  %v2110_v34 = vld [vmem:[#allocation13] ss:$0 sm:$0xff]  ;;  %v2111_v40 = vld [vmem:[#allocation18] ss:$0 sm:$0xff]  ;;  %s2695_s0 = smov 104  }
  0x6d   : > { %s3242_s5 = sld [smem:[#allocation46_spill]]  ;;  %v2112_v41 = vld [vmem:[#allocation19] ss:$0 sm:$0xff]  ;;  %vm1124_vm6 = vcmask 64512   ;;  %v2113_v50 = vld [vmem:[#allocation16] ss:$0 sm:$0xff] }
  0x6e   : > { %vm1256_vm7 = vcmask 1043456   ;;  %s2696_s21 = smov 112   ;;  %s2698_s20 = smov 16   ;;  %vm1337_vm8 = vcmask 126016   ;;  %vm1344_vm9 = vcmask 191616   ;;  %vm1351_vm10 = vcmask 257216  }
  0x6f   : > { %s2699_s17 = smov 24   ;;  %s3243_s6 = sld [smem:[#allocation52_spill]]  ;;  %vm1505_vm14 = vcmask 523264  }
  0x70   : > { %p892_p3 = scmp.lt.s32.totalorder %s3239_s23, 1  ;;  %1009 = vmatpush.bf16.msra.mxu1 %v1895_v19 }
  0x71   : > { %v2123_v5 = vpop.eup %2122 }
  0x72   : > { %s893_s18 = scalar_select %p892_p3, %s3239_s23, 1  ;;  %v911_v6 = vmul.f32 32.0, %v2123_v5  ;;  %vm915_vm1 = vweird.f32 %v2123_v5  ;;  %v1894_v16 = vld [vmem:[%s3241_s8 + $0x8] sm:$0xff]  ;;  %v1893_v18 = vld [vmem:[%s3241_s8] sm:$0xff] }
  0x73   : > { %975 = vmatpush.bf16.msra.mxu0 %v1894_v16  ;;  %v1898_v20 = vld [vmem:[%s3242_s5 + $0x8] sm:$0xff]  ;;  %v1897_v22 = vld [vmem:[%s3242_s5] sm:$0xff]  ;;  %s3247_s8 = sld [smem:[#allocation55_spill]] }
  0x74   : > { %s1818_s4 = sshll.u32 %s893_s18, 3  ;;  %v912_v7 = vsub.f32 1.0, %v911_v6  ;;  %1086 = vmatpush.bf16.msra.mxu2 %v1898_v20  ;;  %s3246_s18 = sld [smem:[#allocation56_spill]] }
  0x75   : > { %s895_s19 = scalar_lea.vmem %s3240_s22, %s1818_s4  ;;  %s3244_s4 = sld [smem:[#allocation53_spill]] }
  0x76   : > { %v901_v0 = vld [vmem:[%s895_s19] sm:$0xff]  ;;  %v913_v8 = vmul.f32 %v2123_v5, %v912_v7  ;;  %s2694_s19 = smov 120   ;;  %s1817_s22 = sshll.u32 %s2982_s27, 3 }
  0x77   : > { %v903_v2 = vadd.f32 %v902_v1, %v901_v0  ;;  %976 = vmatpush.bf16.msra.mxu0 %v1893_v18 }
  0x78   : > { %v914_v9 = vadd.f32 %v2123_v5, %v913_v8  ;;  %1087 = vmatpush.bf16.msra.mxu2 %v1897_v22 }
  0x79   : > { %v907_v3 = vsel %vm906_vm0, %v903_v2, 0.0 }
  0x7a   : > { %908 = vadd.xlane.f32.xlu0 %v907_v3  ;;  %v3024_v10 = vsel %vm915_vm1, %v2123_v5, %v914_v9 }
  0xed   : > { %v909_v11 = vpop.xlane.xlu0 %908 }
  0xee   : > { %v917_v12 = vmul.f32 %v3024_v10, %v909_v11 }
  0xf0   : > { %v918_v13 = vsub.f32 %v903_v2, %v917_v12  ;;  %v2114_v12 = vld [vmem:[%s764_s24] ss:$0 sm:$0xff]  ;;  %s2697_s24 = smov 8  }
  0xf2   : > { %v919_v14 = vmul.f32 %v918_v13, %v918_v13 }
  0xf4   : > { %v920_v15 = vsel %vm906_vm0, %v919_v14, 0.0 }
  0xf5   : > { %921 = vadd.xlane.f32.xlu0 %v920_v15 }
 0x168   : > { %v922_v21 = vpop.xlane.xlu0 %921 }
 0x169   : > { %v923_v23 = vmul.f32 %v922_v21, %v3024_v10 }
 0x16b   : > { %v924_v24 = vadd.f32 1e-05, %v923_v23 }
 0x16d   : > { %2124 = vrsqrt.f32 %v924_v24  ;;  %vm931_vm3 = vweird.f32 %v924_v24 }
 0x173   : > { %v2125_v25 = vpop.eup %2124 }
 0x174   : > { %v926_v26 = vmul.f32 %v2125_v25, %v924_v24  ;;  %vm932_vm2 = vweird.f32 %v2125_v25 }
 0x175   : > { %vm933_vm4 = vmor %vm931_vm3, %vm932_vm2 }
 0x176   : > { %v927_v27 = vmul.f32 %v2125_v25, %v926_v26 }
 0x178   : > { %v928_v28 = vmul.f32 0.5, %v927_v27 }
 0x17a   : > { %v929_v29 = vsub.f32 1.5, %v928_v28 }
 0x17c   : > { %v930_v30 = vmul.f32 %v2125_v25, %v929_v29 }
 0x17e   : > { %v934_v32 = vsel %vm933_vm4, %v2125_v25, %v930_v30 }
 0x17f   : > { %v935_v33 = vmul.f32 %v934_v32, %v918_v13 }
 0x181   : > { %v939_v35 = vmul.f32 %v2109_v31, %v935_v33 }
 0x183   : > { %v943_v36 = vadd.f32 %v2110_v34, %v939_v35 }
 0x185   : > { %944 = vst.msk [vmem:[#allocation2] sm:$0xff] %vm906_vm0, %v943_v36  ;;  %v945_v37 = vpack.c.bf16 %v943_v36, %v943_v36 }
 0x187   : > { %1827 = vmatmul.msk.bf16.vlgmr.msra.gmra.mxu0 %vm906_vm0, %v945_v37  ;;  %1836 = vmatmul.msk.bf16.vlgmr.msra.gmra.mxu1 %vm906_vm0, %v945_v37 }
 0x18c   : > { %v3044_v38 = vld [vmem:[#allocation2] sm:$0xff] }
 0x18d   : > { %v1055_v39 = vpack.c.bf16 %v3044_v38, %v3044_v38 }
 0x18f   : > { %1845 = vmatmul.msk.bf16.vlgmr.msra.gmra.mxu2 %vm906_vm0, %v1055_v39 }
 0x204   : > { %v978_v42 = vpop.f32.mrf.mxu0  ;;  %v1011_v43 = vpop.f32.mrf.mxu1 }
 0x205   : > { %v979_v44 = vadd.f32 %v2111_v40, %v978_v42  ;;  %v1012_v45 = vadd.f32 %v2112_v41, %v1011_v43 }
 0x207   : > { %v1015_v46 = vpack.c.bf16 %v979_v44, %v979_v44  ;;  %v3049_v47 = vpack.c.bf16 %v1012_v45, %v1012_v45 }
 0x209   : > { %1018 = vst.msk [vmem:[#allocation3] sm:$0xf] %vm1017_vm5, %v1015_v46  ;;  %1021 = vrot.lane.b32.xlu2 %v1015_v46, %s2694_s19  ;;  %1042 = vrot.lane.b32.xlu1 %v1015_v46, %s2695_s0 }
 0x20a   : > { %1019 = vst.msk [vmem:[#allocation4] sm:$0xf] %vm1017_vm5, %v3049_v47 }
 0x20c   : > { %v980_v48 = vpop.f32.mrf.mxu0  ;;  %v1013_v49 = vpop.f32.mrf.mxu1 }
 0x210   : > { %v1116_v51 = vld [vmem:[#allocation3] sm:$0xf] }
 0x211   : > { %1032 = vrot.lane.b32.xlu2 %v1015_v46, %s2696_s21  ;;  %v1129_v52 = vsel %vm1124_vm6, %v1116_v51, 0  ;;  %v1249_v53 = vld [vmem:[#allocation4] sm:$0xf] }
 0x212   : > { %v1089_v54 = vpop.f32.mrf.mxu2  ;;  %1138 = vmatpush.bf16.xpose.msra.mxu3 %v1129_v52  ;;  %v1258_v55 = vsel %vm1256_vm7, %v1249_v53, 0 }
 0x213   : > { %v1090_v56 = vadd.f32 %v2113_v50, %v1089_v54 }
 0x215   : > { %v1093_v57 = vpack.c.bf16 %v1090_v56, %v1090_v56 }
 0x217   : > { %1095 = vst.msk [vmem:[#allocation5] sm:$0xf] %vm1017_vm5, %v1093_v57  ;;  %1097 = vrot.lane.b32.xlu0 %v1093_v57, %s2694_s19  ;;  %1107 = vrot.lane.b32.xlu1 %v1093_v57, %s2695_s0 }
 0x21a   : > { %1267 = vmatpush.bf16.msrb.mxu3 %v1258_v55  ;;  %v1091_v58 = vpop.f32.mrf.mxu2 }
 0x21e   : > { %v1112_v59 = vld [vmem:[#allocation5] sm:$0xf] }
 0x21f   : > { %1102 = vrot.lane.b32.xlu1 %v1093_v57, %s2696_s21  ;;  %1846 = vmatmul.msk.bf16.vlgmr.msra.gmra.mxu3 %vm1124_vm6, %v1112_v59 }
 0x263   : > { %v1022_v60 = vpop.permute.xlu2 %1021 }
 0x264   : > { %1025 = vst.msk [vmem:[#allocation3 + $0x4] sm:$0xf] %vm1017_vm5, %v1022_v60 }
 0x26b   : > { %v1033_v61 = vpop.permute.xlu2 %1032  ;;  %v1117_v62 = vld [vmem:[#allocation3 + $0x4] sm:$0xf] }
 0x26c   : > { %1036 = vst.msk [vmem:[#allocation3 + $0x8] sm:$0xf] %vm1017_vm5, %v1033_v61  ;;  %v1148_v63 = vsel %vm1124_vm6, %v1117_v62, 0 }
 0x26d   : > { %1157 = vmatpush.bf16.xpose.msrb.mxu0 %v1148_v63 }
 0x273   : > { %v1118_v0 = vld [vmem:[#allocation3 + $0x8] sm:$0xf] }
 0x274   : > { %v1167_v1 = vsel %vm1124_vm6, %v1118_v0, 0 }
 0x275   : > { %1176 = vmatpush.bf16.xpose.msrb.mxu1 %v1167_v1 }
 0x27b   : > { %v1043_v2 = vpop.permute.xlu1 %1042 }
 0x27c   : > { %1046 = vst.msk [vmem:[#allocation3 + $0xc] sm:$0xf] %vm1017_vm5, %v1043_v2 }
 0x283   : > { %v1119_v3 = vld [vmem:[#allocation3 + $0xc] sm:$0xf] }
 0x284   : > { %v1186_v4 = vsel %vm1124_vm6, %v1119_v3, 0 }
 0x285   : > { %1195 = vmatpush.bf16.xpose.msrb.mxu2 %v1186_v4 }
 0x289   : > { %v1098_v5 = vpop.permute.xlu0 %1097  ;;  %v1108_v6 = vpop.permute.xlu1 %1107 }
 0x28a   : > { %1101 = vst.msk [vmem:[#allocation5 + $0x4] sm:$0xf] %vm1017_vm5, %v1098_v5 }
 0x28b   : > { %1111 = vst.msk [vmem:[#allocation5 + $0xc] sm:$0xf] %vm1017_vm5, %v1108_v6 }
 0x291   : > { %v1103_v7 = vpop.permute.xlu1 %1102  ;;  %v1113_v8 = vld [vmem:[#allocation5 + $0x4] sm:$0xf] }
 0x292   : > { %1106 = vst.msk [vmem:[#allocation5 + $0x8] sm:$0xf] %vm1017_vm5, %v1103_v7  ;;  %1847 = vmatmul.msk.bf16.vlgmr.msrb.gmra.mxu0 %vm1124_vm6, %v1113_v8  ;;  %v1115_v9 = vld [vmem:[#allocation5 + $0xc] sm:$0xf] }
 0x293   : > { %1849 = vmatmul.msk.bf16.vlgmr.msrb.gmra.mxu2 %vm1124_vm6, %v1115_v9 }
 0x299   : > { %v1114_v11 = vld [vmem:[#allocation5 + $0x8] sm:$0xf] }
 0x29a   : > { %1848 = vmatmul.msk.bf16.vlgmr.msrb.gmra.mxu1 %vm1124_vm6, %v1114_v11 }
 0x2a2   : > { %v1140_v13 = vpop.f32.mrf.mxu3 }
 0x2a3   : > { %v1141_v14 = vadd.f32 %v2114_v12, %v1140_v13 }
 0x2a5   : > { %v1201_v15 = vsel %vm1124_vm6, %v1141_v14, -inf }
 0x2a6   : > { %1202 = vmax.xlane.f32.xlu2 %v1201_v15 }
 0x2aa   : > { %v1142_v16 = vpop.f32.mrf.mxu3 }
 0x30f   : > { %v1159_v17 = vpop.f32.mrf.mxu0 }
 0x310   : > { %v1160_v18 = vadd.f32 %v2114_v12, %v1159_v17 }
 0x312   : > { %v1204_v19 = vsel %vm1124_vm6, %v1160_v18, -inf }
 0x313   : > { %1205 = vmax.xlane.f32.xlu1 %v1204_v19 }
 0x316   : > { %v1197_v20 = vpop.f32.mrf.mxu2 }
 0x317   : > { %v1198_v21 = vadd.f32 %v2114_v12, %v1197_v20  ;;  %v1161_v22 = vpop.f32.mrf.mxu0  ;;  %v1178_v23 = vpop.f32.mrf.mxu1 }
 0x318   : > { %v1179_v24 = vadd.f32 %v2114_v12, %v1178_v23 }
 0x319   : > { %v1210_v25 = vsel %vm1124_vm6, %v1198_v21, -inf  ;;  %v1203_v29 = vpop.xlane.xlu2 %1202 }
 0x31a   : > { %1211 = vmax.xlane.f32.xlu2 %v1210_v25  ;;  %v1207_v26 = vsel %vm1124_vm6, %v1179_v24, -inf  ;;  %v1213_v50 = vsub.f32 %v1141_v14, %v1203_v29  ;;  %v1899_v25 = vld [vmem:[#allocation21] sm:$0xff] }
 0x31b   : > { %1208 = vmax.xlane.f32.xlu0 %v1207_v26 }
 0x31c   : > { %v1217_v51 = vmul.f32 1.442695, %v1213_v50 }
 0x31e   : > { %v1199_v27 = vpop.f32.mrf.mxu2 }
 0x31f   : > { %v1180_v28 = vpop.f32.mrf.mxu1 }
 0x332   : > { %1047 = vrot.lane.b32.xlu2 %v3049_v47, %s2695_s0  ;;  %s1557_s0 = scalar_lea.sflag [#allocation9], %s2982_s27 }
 0x386   : > { %v1206_v30 = vpop.xlane.xlu1 %1205 }
 0x387   : > { %v1214_v31 = vsub.f32 %v1160_v18, %v1206_v30  ;;  %v2115_v30 = vld [vmem:[#allocation22] ss:$0 sm:$0xff] }
 0x389   : > { %v1219_v32 = vmul.f32 1.442695, %v1214_v31 }
 0x38b   : > { %2126 = vpow2.f32 %v1219_v32 }
 0x38d   : > { %v1212_v33 = vpop.xlane.xlu2 %1211 }
 0x38e   : > { %v1216_v34 = vsub.f32 %v1198_v21, %v1212_v33  ;;  %v1209_v35 = vpop.xlane.xlu0 %1208 }
 0x38f   : > { %v1215_v36 = vsub.f32 %v1179_v24, %v1209_v35  ;;  %v1900_v24 = vld [vmem:[#allocation21 + $0x8] sm:$0xff] }
 0x390   : > { %v1223_v37 = vmul.f32 1.442695, %v1216_v34  ;;  %1383 = vmatpush.bf16.msra.mxu3 %v1900_v24 }
 0x391   : > { %v2127_v39 = vpop.eup %2126  ;;  %v1221_v40 = vmul.f32 1.442695, %v1215_v36 }
 0x392   : > { %2128 = vpow2.f32 %v1223_v37  ;;  %v1228_v41 = vsel %vm1124_vm6, %v2127_v39, 0.0 }
 0x393   : > { %2130 = vpow2.f32 %v1221_v40  ;;  %1229 = vadd.xlane.f32.xlu0 %v1228_v41 }
 0x394   : > { %2132 = vpow2.f32 %v1217_v51  ;;  %1384 = vmatpush.bf16.msra.mxu3 %v1899_v25 }
 0x395   : > { %v1048_v42 = vpop.permute.xlu2 %1047 }
 0x396   : > { %1051 = vst.msk [vmem:[#allocation4 + $0xc] sm:$0xf] %vm1017_vm5, %v1048_v42  ;;  %v1902_v42 = vld [vmem:[#allocation27 + $0x8] sm:$0xff] }
 0x398   : > { %v2129_v43 = vpop.eup %2128 }
 0x399   : > { %v2131_v44 = vpop.eup %2130  ;;  %v1234_v45 = vsel %vm1124_vm6, %v2129_v43, 0.0 }
 0x39a   : > { %1235 = vadd.xlane.f32.xlu1 %v1234_v45  ;;  %v1231_v46 = vsel %vm1124_vm6, %v2131_v44, 0.0  ;;  %v2133_v52 = vpop.eup %2132 }
 0x39b   : > { %1232 = vadd.xlane.f32.xlu2 %v1231_v46  ;;  %v1225_v53 = vsel %vm1124_vm6, %v2133_v52, 0.0  ;;  %v1905_v46 = vld [vmem:[%s3243_s6 + $0x10] sm:$0xff] }
 0x39d   : > { %v1252_v48 = vld [vmem:[#allocation4 + $0xc] sm:$0xf] }
 0x39e   : > { %v1315_v49 = vsel %vm1256_vm7, %v1252_v48, 0 }
 0x39f   : > { %1324 = vmatpush.bf16.msra.mxu2 %v1315_v49 }
 0x3a7   : > { %1037 = vrot.lane.b32.xlu0 %v3049_v47, %s2696_s21 }
 0x3b3   : > { %1027 = vrot.lane.b32.xlu1 %v3049_v47, %s2694_s19  ;;  %s1890_s19 = sshll.u32 %s3239_s23, 3  ;;  %s891_s23 = scalar_lea.vmem [#allocation30], %s1817_s22 }
 0x3b4   : > { %s1570_s9 = sshll.u32 %s891_s23, 4  ;;  %s1571_s9 = int_to_ptr.vmem [resolvable:$true] %s1570_s9 }
 0x3dd   : > { %1226 = vadd.xlane.f32.xlu1 %v1225_v53 }
 0x406   : > { %v1230_v55 = vpop.xlane.xlu0 %1229 }
 0x40d   : > { %v1236_v54 = vpop.xlane.xlu1 %1235 }
 0x40e   : > { %2134 = vrcp.f32 %v1236_v54  ;;  %v1233_v57 = vpop.xlane.xlu2 %1232 }
 0x40f   : > { %2136 = vrcp.f32 %v1233_v57  ;;  %v2117_v57 = vld [vmem:[#allocation25] ss:$0 sm:$0xff] }
 0x410   : > { %2138 = vrcp.f32 %v1230_v55  ;;  %v2116_v55 = vld [vmem:[#allocation24] ss:$0 sm:$0xff] }
 0x414   : > { %v2135_v56 = vpop.eup %2134 }
 0x415   : > { %v1244_v58 = vmul.f32 %v2135_v56, %v2129_v43  ;;  %v2137_v47 = vpop.eup %2136  ;;  %v1901_v43 = vld [vmem:[#allocation27] sm:$0xff] }
 0x416   : > { %v1243_v61 = vmul.f32 %v2137_v47, %v2131_v44  ;;  %v2139_v2 = vpop.eup %2138 }
 0x417   : > { %v1248_v59 = vpack.c.bf16 %v1244_v58, %v1244_v58  ;;  %v1242_v3 = vmul.f32 %v2139_v2, %v2127_v39 }
 0x418   : > { %v1247_v0 = vpack.c.bf16 %v1243_v61, %v1243_v61  ;;  %v1904_v61 = vld [vmem:[%s3243_s6 + $0x8] sm:$0xff] }
 0x419   : > { %1853 = vmatmul.msk.bf16.vlgmr.msra.gmra.mxu2 %vm1124_vm6, %v1248_v59  ;;  %v1038_v60 = vpop.permute.xlu0 %1037  ;;  %v1246_v6 = vpack.c.bf16 %v1242_v3, %v1242_v3 }
 0x41a   : > { %1041 = vst.msk [vmem:[#allocation4 + $0x8] sm:$0xf] %vm1017_vm5, %v1038_v60 }
 0x421   : > { %v1251_v62 = vld [vmem:[#allocation4 + $0x8] sm:$0xf] }
 0x422   : > { %v1296_v63 = vsel %vm1256_vm7, %v1251_v62, 0  ;;  %v1903_v62 = vld [vmem:[%s3243_s6] sm:$0xff] }
 0x423   : > { %1305 = vmatpush.bf16.msra.mxu1 %v1296_v63  ;;  %v2118_v63 = vld [vmem:[#allocation28] ss:$0 sm:$0xff] }
 0x425   : > { %v1028_v1 = vpop.permute.xlu1 %1027 }
 0x426   : > { %1031 = vst.msk [vmem:[#allocation4 + $0x4] sm:$0xf] %vm1017_vm5, %v1028_v1  ;;  %1852 = vmatmul.msk.bf16.vlgmr.msra.gmra.mxu1 %vm1124_vm6, %v1247_v0 }
 0x42d   : > { %v1250_v4 = vld [vmem:[#allocation4 + $0x4] sm:$0xf] }
 0x42e   : > { %v1277_v5 = vsel %vm1256_vm7, %v1250_v4, 0 }
 0x42f   : > { %1286 = vmatpush.bf16.msra.mxu0 %v1277_v5  ;;  %v2119_v5 = vld [vmem:[%s3244_s4] ss:$0 sm:$0xff]  ;;  %s1568_s4 = scalar_lea.hbm %s3246_s18, %s1890_s19 }
 0x430   : > { %s1572_s10 = sshll.u32 %s1568_s4, 4  ;;  %s1573_s10 = int_to_ptr.hbm [resolvable:$true] %s1572_s10 }
 0x431   : > { %s2580_s21 = sshra.s32 %s1573_s10, 4  ;;  %s2581_s21 = int_to_ptr.hbm [resolvable:$true] %s2580_s21 }
 0x432   : > { %1851 = vmatmul.msk.bf16.vlgmr.msra.gmra.mxu0 %vm1124_vm6, %v1246_v6  ;;  %s2582_s19 = scalar_lea.hbm %s2581_s21, 8  ;;  %p2587_p11 = scmp.lt.s32.totalorder %s2581_s21, %s3246_s18 }
 0x433   : > { %1460 = vmatpush.bf16.msrb.mxu0 %v1902_v42  ;;  %p2583_p1 = scmp.ne.s32.totalorder %s2581_s21, %s2582_s19 }
 0x435   : > { %p2584_p9 = pnand %p2583_p1, %p2960_p5 }
 0x437   : > { %1461 = vmatpush.bf16.msrb.mxu0 %v1901_v43  ;;  %p2585_p10 = pneg %p2584_p9 }
 0x450   : > { %v1227_v7 = vpop.xlane.xlu1 %1226 }
 0x451   : > { %2140 = vrcp.f32 %v1227_v7 }
 0x457   : > { %v2141_v8 = vpop.eup %2140 }
 0x458   : > { %v1241_v9 = vmul.f32 %v2141_v8, %v2133_v52 }
 0x45a   : > { %v1245_v11 = vpack.c.bf16 %v1241_v9, %v1241_v9 }
 0x45c   : > { %1850 = vmatmul.msk.bf16.vlgmr.msrb.gmra.mxu3 %vm1124_vm6, %v1245_v11 }
 0x49c   : > { %v1326_v12 = vpop.f32.mrf.mxu2 }
 0x49d   : > { %v1346_v20 = vpack.c.bf16 %v1326_v12, %v1326_v12 }
 0x4a3   : > { %v1307_v13 = vpop.f32.mrf.mxu1 }
 0x4a4   : > { %v1328_v14 = vpop.f32.mrf.mxu2  ;;  %v1339_v19 = vpack.c.bf16 %v1307_v13, %v1307_v13 }
 0x4ab   : > { %v1309_v15 = vpop.f32.mrf.mxu1 }
 0x4af   : > { %v1288_v16 = vpop.f32.mrf.mxu0 }
 0x4b0   : > { %v1332_v17 = vpack.c.bf16 %v1288_v16, %v1288_v16 }
 0x4b2   : > { %1334 = vrot.lane.b32.xlu0 %v1332_v17, %s2697_s24  ;;  %s3245_s24 = sld [smem:[#allocation54_spill]] }
 0x4b7   : > { %v1290_v18 = vpop.f32.mrf.mxu0 }
 0x4ba   : > { %1341 = vrot.lane.b32.xlu0 %v1339_v19, %s2698_s20 }
 0x4c2   : > { %1348 = vrot.lane.b32.xlu0 %v1346_v20, %s2699_s17 }
 0x4df   : > { %v1269_v21 = vpop.f32.mrf.mxu3 }
 0x4e0   : > { %v1330_v22 = vpack.c.bf16 %v1269_v21, %v1269_v21 }
 0x4e2   : > { %1331 = vst.msk [vmem:[#allocation6] sm:$0xf] %vm1017_vm5, %v1330_v22 }
 0x4e7   : > { %v1271_v23 = vpop.f32.mrf.mxu3 }
 0x524   : > { %v1335_v26 = vpop.permute.xlu0 %1334 }
 0x525   : > { %1338 = vst.msk [vmem:[#allocation6] sm:$0xf] %vm1337_vm8, %v1335_v26  ;;  %v2120_v26 = vld [vmem:[%s3245_s24] ss:$0 sm:$0xff] }
 0x52c   : > { %v1342_v27 = vpop.permute.xlu0 %1341 }
 0x52d   : > { %1345 = vst.msk [vmem:[#allocation6] sm:$0xf] %vm1344_vm9, %v1342_v27 }
 0x534   : > { %v1349_v28 = vpop.permute.xlu0 %1348 }
 0x535   : > { %1352 = vst.msk [vmem:[#allocation6] sm:$0xf] %vm1351_vm10, %v1349_v28  ;;  %v2121_v28 = vld [vmem:[%s3247_s8] ss:$0 sm:$0xff]  ;;  %s2586_s8 = scalar_lea.hbm %s3246_s18, 16 }
 0x536   : > { %p2588_p12 = scmp.lt.s32.totalorder %s2586_s8, %s2582_s19 }
 0x538   : > { %p2589_p13 = por %p2588_p12, %p2587_p11 }
 0x53a   : > { %p2590_p0 = pnand %p2589_p13, %p2585_p10 }
 0x53c   : > { %v1353_v29 = vld [vmem:[#allocation6] sm:$0xf] }
 0x53d   : > { %1862 = vmatmul.msk.bf16.vlgmr.msra.gmra.mxu3 %vm906_vm0, %v1353_v29 }
 0x5c0   : > { %v1386_v31 = vpop.f32.mrf.mxu3 }
 0x5c1   : > { %v1387_v32 = vadd.f32 %v2115_v30, %v1386_v31 }
 0x5c3   : > { %v1390_v33 = vadd.f32 %v1387_v32, %v3044_v38  ;;  %v1906_v38 = vld [vmem:[%s3243_s6 + $0x18] sm:$0xff] }
 0x5c4   : > { %1513 = vmatpush.bf16.msrb.mxu1 %v1906_v38 }
 0x5c5   : > { %v1393_v34 = vsel %vm906_vm0, %v1390_v33, 0.0 }
 0x5c6   : > { %1394 = vadd.xlane.f32.xlu0 %v1393_v34 }
 0x5c8   : > { %v1388_v35 = vpop.f32.mrf.mxu3  ;;  %1514 = vmatpush.bf16.msrb.mxu1 %v1905_v46 }
 0x5cc   : > { %1515 = vmatpush.bf16.msrb.mxu1 %v1904_v61 }
 0x5d0   : > { %1516 = vmatpush.bf16.msrb.mxu1 %v1903_v62 }
 0x639   : > { %v1395_v36 = vpop.xlane.xlu0 %1394 }
 0x63a   : > { %v1403_v37 = vmul.f32 %v1395_v36, %v3024_v10 }
 0x63c   : > { %v1404_v39 = vsub.f32 %v1390_v33, %v1403_v37 }
 0x63e   : > { %v1405_v40 = vmul.f32 %v1404_v39, %v1404_v39 }
 0x640   : > { %v1406_v41 = vsel %vm906_vm0, %v1405_v40, 0.0 }
 0x641   : > { %1407 = vadd.xlane.f32.xlu2 %v1406_v41 }
 0x6b4   : > { %v1408_v44 = vpop.xlane.xlu2 %1407 }
 0x6b5   : > { %v1409_v45 = vmul.f32 %v1408_v44, %v3024_v10 }
 0x6b7   : > { %v1410_v48 = vadd.f32 1e-05, %v1409_v45 }
 0x6b9   : > { %2142 = vrsqrt.f32 %v1410_v48  ;;  %vm1417_vm12 = vweird.f32 %v1410_v48 }
 0x6bf   : > { %v2143_v49 = vpop.eup %2142 }
 0x6c0   : > { %v1412_v50 = vmul.f32 %v2143_v49, %v1410_v48  ;;  %vm1418_vm11 = vweird.f32 %v2143_v49 }
 0x6c1   : > { %vm1419_vm13 = vmor %vm1417_vm12, %vm1418_vm11 }
 0x6c2   : > { %v1413_v51 = vmul.f32 %v2143_v49, %v1412_v50 }
 0x6c4   : > { %v1414_v52 = vmul.f32 0.5, %v1413_v51 }
 0x6c6   : > { %v1415_v53 = vsub.f32 1.5, %v1414_v52 }
 0x6c8   : > { %v1416_v54 = vmul.f32 %v2143_v49, %v1415_v53 }
 0x6ca   : > { %v1420_v56 = vsel %vm1419_vm13, %v2143_v49, %v1416_v54 }
 0x6cb   : > { %v1421_v58 = vmul.f32 %v1420_v56, %v1404_v39 }
 0x6cd   : > { %v1425_v59 = vmul.f32 %v2116_v55, %v1421_v58 }
 0x6cf   : > { %v1429_v60 = vadd.f32 %v2117_v57, %v1425_v59 }
 0x6d1   : > { %v1430_v47 = vpack.c.bf16 %v1429_v60, %v1429_v60 }
 0x6d3   : > { %1871 = vmatmul.msk.bf16.vlgmr.msrb.gmra.mxu0 %vm906_vm0, %v1430_v47 }
 0x750   : > { %v1463_v0 = vpop.f32.mrf.mxu0 }
 0x751   : > { %v1464_v1 = vadd.f32 %v2118_v63, %v1463_v0 }
 0x753   : > { %v1467_v2 = vmax.f32 %v1464_v1, 0.0 }
 0x755   : > { %v1468_v3 = vpack.c.bf16 %v1467_v2, %v1467_v2 }
 0x757   : > { %1888 = vmatmul.msk.bf16.vlgmr.msrb.gmra.mxu1 %vm1505_vm14, %v1468_v3 }
 0x758   : > { %v1465_v4 = vpop.f32.mrf.mxu0 }
 0x7d4   : > { %v1518_v6 = vpop.f32.mrf.mxu1 }
 0x7d5   : > { %v1519_v7 = vadd.f32 %v2119_v5, %v1518_v6 }
 0x7d7   : > { %v1522_v8 = vadd.f32 %v1519_v7, %v1429_v60 }
 0x7d9   : > { %v1525_v9 = vsel %vm906_vm0, %v1522_v8, 0.0 }
 0x7da   : > { %1526 = vadd.xlane.f32.xlu2 %v1525_v9 }
 0x7dc   : > { %v1520_v11 = vpop.f32.mrf.mxu1 }
 0x84d   : > { %v1527_v12 = vpop.xlane.xlu2 %1526 }
 0x84e   : > { %v1528_v13 = vmul.f32 %v1527_v12, %v3024_v10 }
 0x850   : > { %v1529_v14 = vsub.f32 %v1522_v8, %v1528_v13 }
 0x852   : > { %v1530_v15 = vmul.f32 %v1529_v14, %v1529_v14 }
 0x854   : > { %v1531_v16 = vsel %vm906_vm0, %v1530_v15, 0.0 }
 0x855   : > { %1532 = vadd.xlane.f32.xlu1 %v1531_v16 }
 0x8c8   : > { %v1533_v17 = vpop.xlane.xlu1 %1532 }
 0x8c9   : > { %v1534_v18 = vmul.f32 %v1533_v17, %v3024_v10 }
 0x8cb   : > { %v1535_v19 = vadd.f32 1e-05, %v1534_v18 }
 0x8cd   : > { %2144 = vrsqrt.f32 %v1535_v19  ;;  %vm1542_vm1 = vweird.f32 %v1535_v19 }
 0x8d3   : > { %v2145_v20 = vpop.eup %2144 }
 0x8d4   : > { %v1537_v21 = vmul.f32 %v2145_v20, %v1535_v19  ;;  %vm1543_vm15 = vweird.f32 %v2145_v20 }
 0x8d5   : > { %vm1544_vm2 = vmor %vm1542_vm1, %vm1543_vm15 }
 0x8d6   : > { %v1538_v22 = vmul.f32 %v2145_v20, %v1537_v21 }
 0x8d8   : > { %v1539_v23 = vmul.f32 0.5, %v1538_v22 }
 0x8da   : > { %v1540_v24 = vsub.f32 1.5, %v1539_v23 }
 0x8dc   : > { %v1541_v25 = vmul.f32 %v2145_v20, %v1540_v24 }
 0x8de   : > { %v1545_v10 = vsel %vm1544_vm2, %v2145_v20, %v1541_v25 }
 0x8df   : > { %v1546_v27 = vmul.f32 %v1545_v10, %v1529_v14 }
 0x8e1   : > { %v1550_v29 = vmul.f32 %v2120_v26, %v1546_v27 }
 0x8e3   : > { %v1554_v30 = vadd.f32 %v2121_v28, %v1550_v29 }
 0x8e5   : > { %1555 = vst.msk [vmem:[%s891_s23] sm:$0xff] %vm906_vm0, %v1554_v30 }
 0x8e6   : > { %2593 = shalt.err (!%p2590_p0)
}
 0x8e7   : > { %1961 = dma.vmem_to_hbm [thread:$0]  (%p2960_p5), %s1571_s9, 128, %s1573_s10, %s1557_s0  }
 0x8e8 PF: > { %s1584_s27 = sand.u32 1, %s2656_s2   ;;  %p2008_p2 = pnand %p1802_p4, %p2968_p7 }
 0x8e9   : > { %s1585_s20 = scalar_lea.sflag [#allocation9], %s1584_s27 }
 0x8ea   : > { %p2009_p6 = pneg %p2008_p2 }
 0x8ec   : > { %2651 = dma.done.wait (%p2009_p6), %s1585_s20, 128  }
 0x8ed   : > { %2653 = vsyncadd (%p2009_p6), %s1585_s20, 4294967168  ;;  %s44_s28 = sadd.s32 1, %s2676_s28   ;;  %s3248_s2 = smov %s2660_s25 }
 0x8ee   : > { %p41_p8 = scmp.ge.s32.totalorder %s44_s28, 4   ;;  %s3249_s25 = smov %s2664_s26 }
 0x8ef   : > { %s3250_s26 = smov %s2966_s29  ;;  %s3251_s27 = smov %s2672_s3 }
 0x8f0   : > { %s3252_s3 = smov %s3254_s1  ;;  %43 = sbr.rel (!%p41_p8) target bundleno = 30 (0x1e), region = 218 }
 0x8f5   :  { %1591 = vsyncpa [#allocation8], 1 }
 0x8f6   :  { %1593 = vsyncpa [#allocation8 + $0x1], 1 }
 0x8f7   :  { %1594 = vsyncpa [#allocation11], 1 }
 0x8f8   :  { %1595 = vsyncpa [#allocation14], 1 }
 0x8f9   :  { %1596 = vsyncpa [#allocation17], 1 }
 0x8fa   :  { %1597 = vsyncpa [#allocation20], 1 }
 0x8fb   :  { %1598 = vsyncpa [#allocation23], 1 }
 0x8fc   :  { %1599 = vsyncpa [#allocation26], 1 }
 0x8fd   :  { %1600 = vsyncpa [#allocation29], 1 }
 0x8fe   :  { %1601 = vsyncpa [#allocation9], 1 }
 0x8ff   :  { %1603 = vsyncpa [#allocation9 + $0x1], 1 }

</bundles_post_ra>
